<compile_context>
chip_gen: v7x
topology: tpu7x:2x2x1
jax: 0.10.0
libtpu: 0.0.40
codegen_flags: <defaults>
</compile_context>

<pallas_src>
import functools
import math

import jax
import jax.numpy as jnp
from jax import lax
from jax.experimental import pallas as pl


def _mha_kernel(x_ref, w_ref, b_ref, o_ref, *, batch, seq, h_num, h_dim, seg):
    """Single-step kernel: the whole problem (~15 KB) lives in VMEM.

    x_ref : (batch*seq, Din)          flattened input
    w_ref : (Din, 3*seg)              packed, lane-padded [Wq | Wk | Wv]
    b_ref : (1, 3*seg)                packed, lane-padded [bq | bk | bv]
    o_ref : (batch, seq, h_num*h_dim)
    """
    # One fused QKV projection for all batch elements / heads / maps:
    # (B*S, Din) @ (Din, 3*seg) -> single MXU matmul, M = B*S for good sublane fill.
    qkv = (jnp.dot(x_ref[...], w_ref[...], preferred_element_type=jnp.float32)
           + b_ref[...])                                            # (B*S, 3*seg)

    # seg is a multiple of 128 -> tile-aligned, zero-cost segment views.
    q = qkv[:, 0 * seg:1 * seg]
    k = qkv[:, 1 * seg:2 * seg]
    v = jnp.maximum(qkv[:, 2 * seg:3 * seg], 0.0)                   # ReLU on value path

    scale = 1.0 / math.sqrt(h_dim)
    qkT = (((1,), (1,)), ((), ()))        # contract last dims: q @ k^T without explicit k.T

    for b in range(batch):                # static loops: batch & heads folded into one step
        rows = slice(b * seq, (b + 1) * seq)
        q_b, k_b, v_b = q[rows], k[rows], v[rows]
        heads = []
        for h in range(h_num):
            cols = slice(h * h_dim, (h + 1) * h_dim)
            s = lax.dot_general(q_b[:, cols], k_b[:, cols], qkT,
                                preferred_element_type=jnp.float32) * scale   # (S, S)
            # numerically-stable, *exact* softmax (matches F.softmax(dim=-1))
            s = s - jnp.max(s, axis=-1, keepdims=True)
            p = jnp.exp(s)
            p = p / jnp.sum(p, axis=-1, keepdims=True)
            heads.append(jnp.dot(p, v_b[:, cols],
                                 preferred_element_type=jnp.float32))          # (S, hd)
        # one lane-dense (S, H*hd) store per batch element (head order matches torch concat)
        o_ref[b] = jnp.concatenate(heads, axis=-1)


def multi_headed_attention(x, Wq, bq, Wk, bk, Wv, bv, h_num, h_dim):
    """x: (B, S, Din) f32. Wx: (Din, H*hd), bx: (H*hd,)."""
    B, S, Din = x.shape
    Hd = h_num * h_dim
    seg = ((Hd + 127) // 128) * 128            # lane-align each Q/K/V segment to 128 lanes

    def pad(w, b_):
        wp = jnp.zeros((Din, seg), x.dtype).at[:, :Hd].set(w)
        bp = jnp.zeros((seg,), x.dtype).at[:Hd].set(b_)
        return wp, bp

    wq, bq_ = pad(Wq, bq)
    wk, bk_ = pad(Wk, bk)
    wv, bv_ = pad(Wv, bv)
    w_qkv = jnp.concatenate([wq, wk, wv], axis=-1)               # (Din, 3*seg)
    b_qkv = jnp.concatenate([bq_, bk_, bv_], axis=-1)[None, :]   # (1, 3*seg)

    x2 = x.reshape(B * S, Din)                                   # free contiguous reshape

    # Advisory cost estimate so XLA schedules/overlaps the call sensibly.
    flops = 2 * (B * S) * Din * (3 * seg) + B * h_num * (4 * S * S * h_dim)
    transcendentals = B * h_num * S * S
    bytes_accessed = 4 * (B * S * Din + Din * 3 * seg + 3 * seg + B * S * Hd)

    kernel = functools.partial(_mha_kernel, batch=B, seq=S,
                               h_num=h_num, h_dim=h_dim, seg=seg)

    return pl.pallas_call(
        kernel,
        out_shape=jax.ShapeDtypeStruct((B, S, Hd), jnp.float32),
        cost_estimate=pl.CostEstimate(flops=flops,
                                      transcendentals=transcendentals,
                                      bytes_accessed=bytes_accessed),
    )(x2, w_qkv, b_qkv)


def reference_mha(x, Wq, bq, Wk, bk, Wv, bv, h_num, h_dim):
    """Pure-JAX reference mirroring the PyTorch forward (eval mode).

    Uses Precision.HIGHEST so the reference itself is not degraded by XLA's
    default bf16 MXU matmul precision on TPU (previous source of mismatch).
    """
    B, S, Din = x.shape
    hp = jax.lax.Precision.HIGHEST
    q = (jnp.dot(x, Wq, precision=hp) + bq).reshape(B, S, h_num, h_dim).transpose(0, 2, 1, 3)
    k = (jnp.dot(x, Wk, precision=hp) + bk).reshape(B, S, h_num, h_dim).transpose(0, 2, 1, 3)
    v = jax.nn.relu(jnp.dot(x, Wv, precision=hp) + bv).reshape(B, S, h_num, h_dim).transpose(0, 2, 1, 3)

    scores = jnp.einsum("bhqd,bhkd->bhqk", q, k, precision=hp) / math.sqrt(h_dim)
    p = jax.nn.softmax(scores, axis=-1)
    o = jnp.einsum("bhqk,bhkd->bhqd", p, v, precision=hp)
    return o.transpose(0, 2, 1, 3).reshape(B, S, h_num * h_dim)


def init_params(key, h_num, h_dim, input_dim):
    """Deterministic init matching nn.Linear shapes (x @ W + b orientation)."""
    ks = jax.random.split(key, 6)
    bound = 1.0 / math.sqrt(input_dim)
    Hd = h_num * h_dim

    def lin(kw, kb):
        w = jax.random.uniform(kw, (input_dim, Hd), jnp.float32, -bound, bound)
        b = jax.random.uniform(kb, (Hd,), jnp.float32, -bound, bound)
        return w, b

    Wq, bq = lin(ks[0], ks[1])
    Wk, bk = lin(ks[2], ks[3])
    Wv, bv = lin(ks[4], ks[5])
    return Wq, bq, Wk, bk, Wv, bv


if __name__ == "__main__":
    # Module config: h_num=4, h_dim=8, input_frames=1 (-> seq = 1*22 = 22 joints),
    # input_dim=16, dp_rate=0.0 (identity at eval), domain unused by forward().
    h_num, h_dim = 4, 8
    input_frames, joint_num = 1, 22
    input_dim = 16
    B = 2
    S = input_frames * joint_num

    key = jax.random.PRNGKey(0)
    kx, kp = jax.random.split(key)
    x = jax.random.normal(kx, (B, S, input_dim), dtype=jnp.float32)
    Wq, bq, Wk, bk, Wv, bv = init_params(kp, h_num, h_dim, input_dim)

    out = multi_headed_attention(x, Wq, bq, Wk, bk, Wv, bv, h_num, h_dim)
    out = jax.block_until_ready(out)

    ref = reference_mha(x, Wq, bq, Wk, bk, Wv, bv, h_num, h_dim)
    assert out.shape == (B, S, h_num * h_dim)
    assert jnp.allclose(out, ref, atol=2e-3, rtol=2e-3), "mismatch vs reference"

    print("KERNEL_OK")
</pallas_src>

<mosaic_0001>
module attributes {stable_mosaic.version = 11 : i64} {
  func.func @_mha_kernel(%arg0: memref<44x16xf32, #tpu.memory_space<vmem>>, %arg1: memref<16x384xf32, #tpu.memory_space<vmem>>, %arg2: memref<1x384xf32, #tpu.memory_space<vmem>>, %arg3: memref<2x22x32xf32, #tpu.memory_space<vmem>>) attributes {dimension_semantics = [], scalar_prefetch = 0 : i64, scratch_operands = 0 : i64, tpu.core_type = #tpu.core_type<tc>} {
    %c0 = arith.constant 0 : index
    %c0_0 = arith.constant 0 : index
    %0 = vector.load %arg0[%c0, %c0_0] : memref<44x16xf32, #tpu.memory_space<vmem>>, vector<44x16xf32>
    %c0_1 = arith.constant 0 : index
    %c0_2 = arith.constant 0 : index
    %1 = vector.load %arg1[%c0_1, %c0_2] : memref<16x384xf32, #tpu.memory_space<vmem>>, vector<16x384xf32>
    %cst = arith.constant dense<0.000000e+00> : vector<44x384xf32>
    %2 = tpu.matmul %0, %1, %cst {dimension_numbers = #tpu.dot_dimension_numbers<[1], [0], [0], [1], [0, 0, 1, 1], [], []>} : vector<44x16xf32>, vector<16x384xf32>, vector<44x384xf32> -> vector<44x384xf32>
    %c0_3 = arith.constant 0 : index
    %c0_4 = arith.constant 0 : index
    %3 = vector.load %arg2[%c0_3, %c0_4] : memref<1x384xf32, #tpu.memory_space<vmem>>, vector<1x384xf32>
    %4 = vector.broadcast %3 : vector<1x384xf32> to vector<44x384xf32>
    %5 = arith.addf %2, %4 : vector<44x384xf32>
    %6 = vector.extract_strided_slice %5 {offsets = [0, 0], sizes = [44, 128], strides = [1, 1]} : vector<44x384xf32> to vector<44x128xf32>
    %7 = vector.extract_strided_slice %5 {offsets = [0, 128], sizes = [44, 128], strides = [1, 1]} : vector<44x384xf32> to vector<44x128xf32>
    %8 = vector.extract_strided_slice %5 {offsets = [0, 256], sizes = [44, 128], strides = [1, 1]} : vector<44x384xf32> to vector<44x128xf32>
    %cst_5 = arith.constant 0.000000e+00 : f32
    %9 = vector.broadcast %cst_5 : f32 to vector<44x128xf32>
    %10 = arith.maximumf %8, %9 : vector<44x128xf32>
    %11 = vector.extract_strided_slice %6 {offsets = [0, 0], sizes = [22, 128], strides = [1, 1]} : vector<44x128xf32> to vector<22x128xf32>
    %12 = vector.extract_strided_slice %7 {offsets = [0, 0], sizes = [22, 128], strides = [1, 1]} : vector<44x128xf32> to vector<22x128xf32>
    %13 = vector.extract_strided_slice %10 {offsets = [0, 0], sizes = [22, 128], strides = [1, 1]} : vector<44x128xf32> to vector<22x128xf32>
    %14 = vector.extract_strided_slice %11 {offsets = [0, 0], sizes = [22, 8], strides = [1, 1]} : vector<22x128xf32> to vector<22x8xf32>
    %15 = vector.extract_strided_slice %12 {offsets = [0, 0], sizes = [22, 8], strides = [1, 1]} : vector<22x128xf32> to vector<22x8xf32>
    %cst_6 = arith.constant dense<0.000000e+00> : vector<22x22xf32>
    %16 = tpu.matmul %14, %15, %cst_6 {dimension_numbers = #tpu.dot_dimension_numbers<[1], [1], [0], [0], [0, 0, 1, 0], [], []>} : vector<22x8xf32>, vector<22x8xf32>, vector<22x22xf32> -> vector<22x22xf32>
    %cst_7 = arith.constant 0.353553385 : f32
    %17 = vector.broadcast %cst_7 : f32 to vector<22x22xf32>
    %18 = arith.mulf %16, %17 : vector<22x22xf32>
    %cst_8 = arith.constant dense<0xFF800000> : vector<22xf32>
    %19 = vector.multi_reduction <maximumf>, %18, %cst_8 [1] : vector<22x22xf32> to vector<22xf32>
    %20 = vector.shape_cast %19 : vector<22xf32> to vector<22x1xf32>
    %21 = vector.broadcast %20 : vector<22x1xf32> to vector<22x22xf32>
    %22 = arith.subf %18, %21 : vector<22x22xf32>
    %23 = math.exp %22 : vector<22x22xf32>
    %cst_9 = arith.constant dense<0.000000e+00> : vector<22xf32>
    %24 = vector.multi_reduction <add>, %23, %cst_9 [1] : vector<22x22xf32> to vector<22xf32>
    %25 = vector.shape_cast %24 : vector<22xf32> to vector<22x1xf32>
    %26 = vector.broadcast %25 : vector<22x1xf32> to vector<22x22xf32>
    %27 = arith.divf %23, %26 : vector<22x22xf32>
    %28 = vector.extract_strided_slice %13 {offsets = [0, 0], sizes = [22, 8], strides = [1, 1]} : vector<22x128xf32> to vector<22x8xf32>
    %cst_10 = arith.constant dense<0.000000e+00> : vector<22x8xf32>
    %29 = tpu.matmul %27, %28, %cst_10 {dimension_numbers = #tpu.dot_dimension_numbers<[1], [0], [0], [1], [0, 0, 1, 1], [], []>} : vector<22x22xf32>, vector<22x8xf32>, vector<22x8xf32> -> vector<22x8xf32>
    %30 = vector.extract_strided_slice %11 {offsets = [0, 8], sizes = [22, 8], strides = [1, 1]} : vector<22x128xf32> to vector<22x8xf32>
    %31 = vector.extract_strided_slice %12 {offsets = [0, 8], sizes = [22, 8], strides = [1, 1]} : vector<22x128xf32> to vector<22x8xf32>
    %cst_11 = arith.constant dense<0.000000e+00> : vector<22x22xf32>
    %32 = tpu.matmul %30, %31, %cst_11 {dimension_numbers = #tpu.dot_dimension_numbers<[1], [1], [0], [0], [0, 0, 1, 0], [], []>} : vector<22x8xf32>, vector<22x8xf32>, vector<22x22xf32> -> vector<22x22xf32>
    %cst_12 = arith.constant 0.353553385 : f32
    %33 = vector.broadcast %cst_12 : f32 to vector<22x22xf32>
    %34 = arith.mulf %32, %33 : vector<22x22xf32>
    %cst_13 = arith.constant dense<0xFF800000> : vector<22xf32>
    %35 = vector.multi_reduction <maximumf>, %34, %cst_13 [1] : vector<22x22xf32> to vector<22xf32>
    %36 = vector.shape_cast %35 : vector<22xf32> to vector<22x1xf32>
    %37 = vector.broadcast %36 : vector<22x1xf32> to vector<22x22xf32>
    %38 = arith.subf %34, %37 : vector<22x22xf32>
    %39 = math.exp %38 : vector<22x22xf32>
    %cst_14 = arith.constant dense<0.000000e+00> : vector<22xf32>
    %40 = vector.multi_reduction <add>, %39, %cst_14 [1] : vector<22x22xf32> to vector<22xf32>
    %41 = vector.shape_cast %40 : vector<22xf32> to vector<22x1xf32>
    %42 = vector.broadcast %41 : vector<22x1xf32> to vector<22x22xf32>
    %43 = arith.divf %39, %42 : vector<22x22xf32>
    %44 = vector.extract_strided_slice %13 {offsets = [0, 8], sizes = [22, 8], strides = [1, 1]} : vector<22x128xf32> to vector<22x8xf32>
    %cst_15 = arith.constant dense<0.000000e+00> : vector<22x8xf32>
    %45 = tpu.matmul %43, %44, %cst_15 {dimension_numbers = #tpu.dot_dimension_numbers<[1], [0], [0], [1], [0, 0, 1, 1], [], []>} : vector<22x22xf32>, vector<22x8xf32>, vector<22x8xf32> -> vector<22x8xf32>
    %46 = vector.extract_strided_slice %11 {offsets = [0, 16], sizes = [22, 8], strides = [1, 1]} : vector<22x128xf32> to vector<22x8xf32>
    %47 = vector.extract_strided_slice %12 {offsets = [0, 16], sizes = [22, 8], strides = [1, 1]} : vector<22x128xf32> to vector<22x8xf32>
    %cst_16 = arith.constant dense<0.000000e+00> : vector<22x22xf32>
    %48 = tpu.matmul %46, %47, %cst_16 {dimension_numbers = #tpu.dot_dimension_numbers<[1], [1], [0], [0], [0, 0, 1, 0], [], []>} : vector<22x8xf32>, vector<22x8xf32>, vector<22x22xf32> -> vector<22x22xf32>
    %cst_17 = arith.constant 0.353553385 : f32
    %49 = vector.broadcast %cst_17 : f32 to vector<22x22xf32>
    %50 = arith.mulf %48, %49 : vector<22x22xf32>
    %cst_18 = arith.constant dense<0xFF800000> : vector<22xf32>
    %51 = vector.multi_reduction <maximumf>, %50, %cst_18 [1] : vector<22x22xf32> to vector<22xf32>
    %52 = vector.shape_cast %51 : vector<22xf32> to vector<22x1xf32>
    %53 = vector.broadcast %52 : vector<22x1xf32> to vector<22x22xf32>
    %54 = arith.subf %50, %53 : vector<22x22xf32>
    %55 = math.exp %54 : vector<22x22xf32>
    %cst_19 = arith.constant dense<0.000000e+00> : vector<22xf32>
    %56 = vector.multi_reduction <add>, %55, %cst_19 [1] : vector<22x22xf32> to vector<22xf32>
    %57 = vector.shape_cast %56 : vector<22xf32> to vector<22x1xf32>
    %58 = vector.broadcast %57 : vector<22x1xf32> to vector<22x22xf32>
    %59 = arith.divf %55, %58 : vector<22x22xf32>
    %60 = vector.extract_strided_slice %13 {offsets = [0, 16], sizes = [22, 8], strides = [1, 1]} : vector<22x128xf32> to vector<22x8xf32>
    %cst_20 = arith.constant dense<0.000000e+00> : vector<22x8xf32>
    %61 = tpu.matmul %59, %60, %cst_20 {dimension_numbers = #tpu.dot_dimension_numbers<[1], [0], [0], [1], [0, 0, 1, 1], [], []>} : vector<22x22xf32>, vector<22x8xf32>, vector<22x8xf32> -> vector<22x8xf32>
    %62 = vector.extract_strided_slice %11 {offsets = [0, 24], sizes = [22, 8], strides = [1, 1]} : vector<22x128xf32> to vector<22x8xf32>
    %63 = vector.extract_strided_slice %12 {offsets = [0, 24], sizes = [22, 8], strides = [1, 1]} : vector<22x128xf32> to vector<22x8xf32>
    %cst_21 = arith.constant dense<0.000000e+00> : vector<22x22xf32>
    %64 = tpu.matmul %62, %63, %cst_21 {dimension_numbers = #tpu.dot_dimension_numbers<[1], [1], [0], [0], [0, 0, 1, 0], [], []>} : vector<22x8xf32>, vector<22x8xf32>, vector<22x22xf32> -> vector<22x22xf32>
    %cst_22 = arith.constant 0.353553385 : f32
    %65 = vector.broadcast %cst_22 : f32 to vector<22x22xf32>
    %66 = arith.mulf %64, %65 : vector<22x22xf32>
    %cst_23 = arith.constant dense<0xFF800000> : vector<22xf32>
    %67 = vector.multi_reduction <maximumf>, %66, %cst_23 [1] : vector<22x22xf32> to vector<22xf32>
    %68 = vector.shape_cast %67 : vector<22xf32> to vector<22x1xf32>
    %69 = vector.broadcast %68 : vector<22x1xf32> to vector<22x22xf32>
    %70 = arith.subf %66, %69 : vector<22x22xf32>
    %71 = math.exp %70 : vector<22x22xf32>
    %cst_24 = arith.constant dense<0.000000e+00> : vector<22xf32>
    %72 = vector.multi_reduction <add>, %71, %cst_24 [1] : vector<22x22xf32> to vector<22xf32>
    %73 = vector.shape_cast %72 : vector<22xf32> to vector<22x1xf32>
    %74 = vector.broadcast %73 : vector<22x1xf32> to vector<22x22xf32>
    %75 = arith.divf %71, %74 : vector<22x22xf32>
    %76 = vector.extract_strided_slice %13 {offsets = [0, 24], sizes = [22, 8], strides = [1, 1]} : vector<22x128xf32> to vector<22x8xf32>
    %cst_25 = arith.constant dense<0.000000e+00> : vector<22x8xf32>
    %77 = tpu.matmul %75, %76, %cst_25 {dimension_numbers = #tpu.dot_dimension_numbers<[1], [0], [0], [1], [0, 0, 1, 1], [], []>} : vector<22x22xf32>, vector<22x8xf32>, vector<22x8xf32> -> vector<22x8xf32>
    %78 = tpu.concatenate %29, %45, %61, %77 in 1 : vector<22x8xf32>, vector<22x8xf32>, vector<22x8xf32>, vector<22x8xf32> -> vector<22x32xf32>
    %c0_26 = arith.constant 0 : index
    %c0_27 = arith.constant 0 : index
    %c0_28 = arith.constant 0 : index
    %79 = vector.load %arg3[%c0_26, %c0_27, %c0_28] : memref<2x22x32xf32, #tpu.memory_space<vmem>>, vector<1x22x32xf32>
    %80 = vector.shape_cast %79 : vector<1x22x32xf32> to vector<22x32xf32>
    %81 = vector.shape_cast %78 : vector<22x32xf32> to vector<1x22x32xf32>
    tpu.vector_store %arg3[%c0_26, %c0_27, %c0_28], %81 {strides = array<i32>} : memref<2x22x32xf32, #tpu.memory_space<vmem>>, vector<1x22x32xf32>,
    %82 = vector.extract_strided_slice %6 {offsets = [22, 0], sizes = [22, 128], strides = [1, 1]} : vector<44x128xf32> to vector<22x128xf32>
    %83 = vector.extract_strided_slice %7 {offsets = [22, 0], sizes = [22, 128], strides = [1, 1]} : vector<44x128xf32> to vector<22x128xf32>
    %84 = vector.extract_strided_slice %10 {offsets = [22, 0], sizes = [22, 128], strides = [1, 1]} : vector<44x128xf32> to vector<22x128xf32>
    %85 = vector.extract_strided_slice %82 {offsets = [0, 0], sizes = [22, 8], strides = [1, 1]} : vector<22x128xf32> to vector<22x8xf32>
    %86 = vector.extract_strided_slice %83 {offsets = [0, 0], sizes = [22, 8], strides = [1, 1]} : vector<22x128xf32> to vector<22x8xf32>
    %cst_29 = arith.constant dense<0.000000e+00> : vector<22x22xf32>
    %87 = tpu.matmul %85, %86, %cst_29 {dimension_numbers = #tpu.dot_dimension_numbers<[1], [1], [0], [0], [0, 0, 1, 0], [], []>} : vector<22x8xf32>, vector<22x8xf32>, vector<22x22xf32> -> vector<22x22xf32>
    %cst_30 = arith.constant 0.353553385 : f32
    %88 = vector.broadcast %cst_30 : f32 to vector<22x22xf32>
    %89 = arith.mulf %87, %88 : vector<22x22xf32>
    %cst_31 = arith.constant dense<0xFF800000> : vector<22xf32>
    %90 = vector.multi_reduction <maximumf>, %89, %cst_31 [1] : vector<22x22xf32> to vector<22xf32>
    %91 = vector.shape_cast %90 : vector<22xf32> to vector<22x1xf32>
    %92 = vector.broadcast %91 : vector<22x1xf32> to vector<22x22xf32>
    %93 = arith.subf %89, %92 : vector<22x22xf32>
    %94 = math.exp %93 : vector<22x22xf32>
    %cst_32 = arith.constant dense<0.000000e+00> : vector<22xf32>
    %95 = vector.multi_reduction <add>, %94, %cst_32 [1] : vector<22x22xf32> to vector<22xf32>
    %96 = vector.shape_cast %95 : vector<22xf32> to vector<22x1xf32>
    %97 = vector.broadcast %96 : vector<22x1xf32> to vector<22x22xf32>
    %98 = arith.divf %94, %97 : vector<22x22xf32>
    %99 = vector.extract_strided_slice %84 {offsets = [0, 0], sizes = [22, 8], strides = [1, 1]} : vector<22x128xf32> to vector<22x8xf32>
    %cst_33 = arith.constant dense<0.000000e+00> : vector<22x8xf32>
    %100 = tpu.matmul %98, %99, %cst_33 {dimension_numbers = #tpu.dot_dimension_numbers<[1], [0], [0], [1], [0, 0, 1, 1], [], []>} : vector<22x22xf32>, vector<22x8xf32>, vector<22x8xf32> -> vector<22x8xf32>
    %101 = vector.extract_strided_slice %82 {offsets = [0, 8], sizes = [22, 8], strides = [1, 1]} : vector<22x128xf32> to vector<22x8xf32>
    %102 = vector.extract_strided_slice %83 {offsets = [0, 8], sizes = [22, 8], strides = [1, 1]} : vector<22x128xf32> to vector<22x8xf32>
    %cst_34 = arith.constant dense<0.000000e+00> : vector<22x22xf32>
    %103 = tpu.matmul %101, %102, %cst_34 {dimension_numbers = #tpu.dot_dimension_numbers<[1], [1], [0], [0], [0, 0, 1, 0], [], []>} : vector<22x8xf32>, vector<22x8xf32>, vector<22x22xf32> -> vector<22x22xf32>
    %cst_35 = arith.constant 0.353553385 : f32
    %104 = vector.broadcast %cst_35 : f32 to vector<22x22xf32>
    %105 = arith.mulf %103, %104 : vector<22x22xf32>
    %cst_36 = arith.constant dense<0xFF800000> : vector<22xf32>
    %106 = vector.multi_reduction <maximumf>, %105, %cst_36 [1] : vector<22x22xf32> to vector<22xf32>
    %107 = vector.shape_cast %106 : vector<22xf32> to vector<22x1xf32>
    %108 = vector.broadcast %107 : vector<22x1xf32> to vector<22x22xf32>
    %109 = arith.subf %105, %108 : vector<22x22xf32>
    %110 = math.exp %109 : vector<22x22xf32>
    %cst_37 = arith.constant dense<0.000000e+00> : vector<22xf32>
    %111 = vector.multi_reduction <add>, %110, %cst_37 [1] : vector<22x22xf32> to vector<22xf32>
    %112 = vector.shape_cast %111 : vector<22xf32> to vector<22x1xf32>
    %113 = vector.broadcast %112 : vector<22x1xf32> to vector<22x22xf32>
    %114 = arith.divf %110, %113 : vector<22x22xf32>
    %115 = vector.extract_strided_slice %84 {offsets = [0, 8], sizes = [22, 8], strides = [1, 1]} : vector<22x128xf32> to vector<22x8xf32>
    %cst_38 = arith.constant dense<0.000000e+00> : vector<22x8xf32>
    %116 = tpu.matmul %114, %115, %cst_38 {dimension_numbers = #tpu.dot_dimension_numbers<[1], [0], [0], [1], [0, 0, 1, 1], [], []>} : vector<22x22xf32>, vector<22x8xf32>, vector<22x8xf32> -> vector<22x8xf32>
    %117 = vector.extract_strided_slice %82 {offsets = [0, 16], sizes = [22, 8], strides = [1, 1]} : vector<22x128xf32> to vector<22x8xf32>
    %118 = vector.extract_strided_slice %83 {offsets = [0, 16], sizes = [22, 8], strides = [1, 1]} : vector<22x128xf32> to vector<22x8xf32>
    %cst_39 = arith.constant dense<0.000000e+00> : vector<22x22xf32>
    %119 = tpu.matmul %117, %118, %cst_39 {dimension_numbers = #tpu.dot_dimension_numbers<[1], [1], [0], [0], [0, 0, 1, 0], [], []>} : vector<22x8xf32>, vector<22x8xf32>, vector<22x22xf32> -> vector<22x22xf32>
    %cst_40 = arith.constant 0.353553385 : f32
    %120 = vector.broadcast %cst_40 : f32 to vector<22x22xf32>
    %121 = arith.mulf %119, %120 : vector<22x22xf32>
    %cst_41 = arith.constant dense<0xFF800000> : vector<22xf32>
    %122 = vector.multi_reduction <maximumf>, %121, %cst_41 [1] : vector<22x22xf32> to vector<22xf32>
    %123 = vector.shape_cast %122 : vector<22xf32> to vector<22x1xf32>
    %124 = vector.broadcast %123 : vector<22x1xf32> to vector<22x22xf32>
    %125 = arith.subf %121, %124 : vector<22x22xf32>
    %126 = math.exp %125 : vector<22x22xf32>
    %cst_42 = arith.constant dense<0.000000e+00> : vector<22xf32>
    %127 = vector.multi_reduction <add>, %126, %cst_42 [1] : vector<22x22xf32> to vector<22xf32>
    %128 = vector.shape_cast %127 : vector<22xf32> to vector<22x1xf32>
    %129 = vector.broadcast %128 : vector<22x1xf32> to vector<22x22xf32>
    %130 = arith.divf %126, %129 : vector<22x22xf32>
    %131 = vector.extract_strided_slice %84 {offsets = [0, 16], sizes = [22, 8], strides = [1, 1]} : vector<22x128xf32> to vector<22x8xf32>
    %cst_43 = arith.constant dense<0.000000e+00> : vector<22x8xf32>
    %132 = tpu.matmul %130, %131, %cst_43 {dimension_numbers = #tpu.dot_dimension_numbers<[1], [0], [0], [1], [0, 0, 1, 1], [], []>} : vector<22x22xf32>, vector<22x8xf32>, vector<22x8xf32> -> vector<22x8xf32>
    %133 = vector.extract_strided_slice %82 {offsets = [0, 24], sizes = [22, 8], strides = [1, 1]} : vector<22x128xf32> to vector<22x8xf32>
    %134 = vector.extract_strided_slice %83 {offsets = [0, 24], sizes = [22, 8], strides = [1, 1]} : vector<22x128xf32> to vector<22x8xf32>
    %cst_44 = arith.constant dense<0.000000e+00> : vector<22x22xf32>
    %135 = tpu.matmul %133, %134, %cst_44 {dimension_numbers = #tpu.dot_dimension_numbers<[1], [1], [0], [0], [0, 0, 1, 0], [], []>} : vector<22x8xf32>, vector<22x8xf32>, vector<22x22xf32> -> vector<22x22xf32>
    %cst_45 = arith.constant 0.353553385 : f32
    %136 = vector.broadcast %cst_45 : f32 to vector<22x22xf32>
    %137 = arith.mulf %135, %136 : vector<22x22xf32>
    %cst_46 = arith.constant dense<0xFF800000> : vector<22xf32>
    %138 = vector.multi_reduction <maximumf>, %137, %cst_46 [1] : vector<22x22xf32> to vector<22xf32>
    %139 = vector.shape_cast %138 : vector<22xf32> to vector<22x1xf32>
    %140 = vector.broadcast %139 : vector<22x1xf32> to vector<22x22xf32>
    %141 = arith.subf %137, %140 : vector<22x22xf32>
    %142 = math.exp %141 : vector<22x22xf32>
    %cst_47 = arith.constant dense<0.000000e+00> : vector<22xf32>
    %143 = vector.multi_reduction <add>, %142, %cst_47 [1] : vector<22x22xf32> to vector<22xf32>
    %144 = vector.shape_cast %143 : vector<22xf32> to vector<22x1xf32>
    %145 = vector.broadcast %144 : vector<22x1xf32> to vector<22x22xf32>
    %146 = arith.divf %142, %145 : vector<22x22xf32>
    %147 = vector.extract_strided_slice %84 {offsets = [0, 24], sizes = [22, 8], strides = [1, 1]} : vector<22x128xf32> to vector<22x8xf32>
    %cst_48 = arith.constant dense<0.000000e+00> : vector<22x8xf32>
    %148 = tpu.matmul %146, %147, %cst_48 {dimension_numbers = #tpu.dot_dimension_numbers<[1], [0], [0], [1], [0, 0, 1, 1], [], []>} : vector<22x22xf32>, vector<22x8xf32>, vector<22x8xf32> -> vector<22x8xf32>
    %149 = tpu.concatenate %100, %116, %132, %148 in 1 : vector<22x8xf32>, vector<22x8xf32>, vector<22x8xf32>, vector<22x8xf32> -> vector<22x32xf32>
    %c1 = arith.constant 1 : index
    %c0_49 = arith.constant 0 : index
    %c0_50 = arith.constant 0 : index
    %150 = vector.load %arg3[%c1, %c0_49, %c0_50] : memref<2x22x32xf32, #tpu.memory_space<vmem>>, vector<1x22x32xf32>
    %151 = vector.shape_cast %150 : vector<1x22x32xf32> to vector<22x32xf32>
    %152 = vector.shape_cast %149 : vector<22x32xf32> to vector<1x22x32xf32>
    tpu.vector_store %arg3[%c1, %c0_49, %c0_50], %152 {strides = array<i32>} : memref<2x22x32xf32, #tpu.memory_space<vmem>>, vector<1x22x32xf32>,
    return
  }
}

</mosaic_0001>

<bundles_post_ra>
// kernel: tpu_custom_call.1
= control target key start
LH: loop header
LB: loop body
LE: loop exit
PB: predicated region body
PF: predicated region fallthrough
CT: control target
= control target key end

     0   :  { %v2969_v3 = vmov 0.0   ;;  %vm43_vm0 = vcmask 130048   ;;  %v2970_v16 = vmov 0.0|0.0   ;;  %vm2971_vm1 = vmmov 0   ;;  %s2973_s9 = smov 120   ;;  %s2974_s10 = smov 104   ;;  %s3743_s1 = inlined_call_operand.vmem [shape: f32[16,384], index: 1, kind: input, shape index: {}]   ;;  %s3744_s0 = inlined_call_operand.vmem [shape: f32[44,16], index: 0, kind: input, shape index: {}]   ;;  %s3745_s2 = inlined_call_operand.vmem [shape: f32[1,384], index: 2, kind: input, shape index: {}]   ;;  %s3746_s3 = inlined_call_operand.vmem [shape: f32[2,22,32], index: 3, kind: output, shape index: {}]  }
   0x1   :  { %v21_v0 = vld [vmem:[%s3743_s1 + $0x8] sm:$0xff]  ;;  %v24_v1 = vld [vmem:[%s3743_s1 + $0x20] sm:$0xff]  ;;  %126 = vmatprep.mubr.f32.mxu0 %v2969_v3  ;;  %156 = vmatprep.mubr.f32.mxu1 %v2969_v3  ;;  %v23_v5 = vld [vmem:[%s3743_s1 + $0x18] sm:$0xff]  ;;  %v28_v17 = vlaneseq  ;;  %vm264_vm2 = vcmask 64512   ;;  %vm1267_vm4 = vcmask 1041408   ;;  %vm410_vm5 = vcmask 1045504  }
   0x2   :  { %v20_v2 = vld [vmem:[%s3743_s1] sm:$0xff]  ;;  %v2738_v4 = vpack.c.bf16 %v24_v1, %v21_v0  ;;  %v22_v7 = vld [vmem:[%s3743_s1 + $0x10] sm:$0xff]  ;;  %v25_v8 = vld [vmem:[%s3743_s1 + $0x28] sm:$0xff]  ;;  %vm366_vm6 = vcmask 179200   ;;  %vm373_vm7 = vcmask 177152   ;;  %s2975_s11 = smov 8  }
   0x3   :  { %v2740_v6 = vpack.c.bf16 %v23_v5, %v20_v2  ;;  %v14_v9 = vld [vmem:[%s3744_s0] sm:$0xff]  ;;  %v19_v10 = vld [vmem:[%s3744_s0 + $0x28] sm:$0xf]  ;;  %v2742_v11 = vpack.c.bf16 %v25_v8, %v22_v7  ;;  %v16_v13 = vld [vmem:[%s3744_s0 + $0x10] sm:$0xff]  ;;  %v3058_v18 = vshrl.u32 %v28_v17, 7  ;;  %s2976_s12 = smov 16  }
   0x4   :  { %2739 = vmatprep.subr.bf16.mxu0 %v2738_v4  ;;  %2802 = vmatprep.subr.bf16.mxu1 %v2738_v4  ;;  %v15_v12 = vld [vmem:[%s3744_s0 + $0x8] sm:$0xff]  ;;  %v17_v14 = vld [vmem:[%s3744_s0 + $0x18] sm:$0xff]  ;;  %v18_v15 = vld [vmem:[%s3744_s0 + $0x20] sm:$0xff]  ;;  %s2977_s13 = smov 24   ;;  %vm1255_vm8 = vcmask 195584   ;;  %vm1259_vm9 = vcmask 261120  }
   0x5   :  { %2741 = vmatpush1.bf16.msra.mxu0 %v2740_v6  ;;  %2803 = vmatpush1.bf16.msra.mxu1 %v2740_v6  ;;  %v34_v19 = vsub.s32 1, %v3058_v18  ;;  %v3064_v20 = vld [vmem:[%s3745_s2] sm:$0x7]  ;;  %v30_v26 = vsub.s32 0, %v3058_v18  ;;  %vm3071_vm3 = vmpackc.low %vm264_vm2, %vm264_vm2  ;;  %s2972_s2 = smov 112   ;;  %v38_v4 = vsub.s32 2, %v3058_v18 }
   0x6   :  { %2743 = vmatprep.subr.bf16.mxu1 %v2742_v11  ;;  %2750 = vmatprep.subr.bf16.mxu0 %v2970_v16  ;;  %vm1262_vm10 = vcmask 259072  }
   0x7   :  { %v35_v25 = vrot.slane %v3064_v20, %v34_v19  ;;  %v31_v31 = vrot.slane %v3064_v20, %v30_v26  ;;  %v39_v7 = vrot.slane %v3064_v20, %v38_v4 }
   0x8   :  { %2286 = vmatmul.mubr.msk.f32.vlgmr.msra.gmra.mrb[0].mxu0 %vm43_vm0, %v14_v9  ;;  %2291 = vmatmul.mubr.msk.f32.vlgmr.msra.gmra.mrb[0].mxu1 %vm43_vm0, %v19_v10 }
   0x9   :  { %132 = vmatprep.mubr.f32.mxu0 %v2969_v3  ;;  %2745 = vmatpush3.bf16.msra.mxu1 %v2742_v11 }
   0xa   :  { %2489 = vmatprep.mubr.msk.f32.mxu1 %vm43_vm0, %v14_v9  ;;  %2746 = vmatprep.subr.bf16.mxu1 %v2970_v16 }
   0xc   :  { %2287 = vmatmul.mubr.msk.f32.gmra.mrb[2].mxu0 %vm43_vm0, %v15_v12  ;;  %2490 = vmatmul.mubr.msk.f32.vlgmr.msra.gmra.mrb[2].mxu1 %vm43_vm0, %v15_v12 }
   0xd   :  { %138 = vmatprep.mubr.f32.mxu0 %v2969_v3  ;;  %2492 = vmatprep.mubr.msk.f32.mxu1 %vm43_vm0, %v16_v13 }
  0x10   :  { %2288 = vmatmul.mubr.msk.f32.gmra.mrb[4].mxu0 %vm43_vm0, %v16_v13  ;;  %2493 = vmatmul.mubr.msk.f32.gmra.mrb[4].mxu1 %vm43_vm0, %v17_v14 }
  0x11   :  { %144 = vmatprep.mubr.f32.mxu0 %v2969_v3  ;;  %2495 = vmatprep.mubr.msk.f32.mxu1 %vm43_vm0, %v18_v15 }
  0x14   :  { %2289 = vmatmul.mubr.msk.f32.gmra.mrb[6].mxu0 %vm43_vm0, %v17_v14  ;;  %2496 = vmatmul.mubr.msk.f32.gmra.mrb[6].mxu1 %vm43_vm0, %v19_v10 }
  0x15   :  { %150 = vmatprep.mubr.f32.mxu0 %v2969_v3  ;;  %2504 = vmatprep.mubr.msk.f32.mxu1 %vm2971_vm1, %v2969_v3 }
  0x18   :  { %2290 = vmatmul.mubr.msk.f32.gmra.mrb[8].mxu0 %vm43_vm0, %v18_v15 }
  0x19   :  { %2519 = vmatprep.mubr.msk.f32.mxu0 %vm2971_vm1, %v2969_v3 }
  0xdb   :  { %v128_v21 = vpop.f32.mrb[0].mxu0  ;;  %v158_v22 = vpop.f32.mrb[0].mxu1 }
  0xdc   :  { %v130_v23 = vpop.f32.mrb[1].mxu0  ;;  %v160_v24 = vpop.f32.mrb[1].mxu1  ;;  %v129_v39 = vadd.f32 %v128_v21, %v31_v31  ;;  %v159_v43 = vadd.f32 %v158_v22, %v31_v31 }
  0xdd   :  { %v131_v29 = vadd.f32 %v130_v23, %v35_v25  ;;  %v161_v47 = vadd.f32 %v160_v24, %v35_v25 }
  0xde   :  { %v1273_v54 = vrot.slane %v159_v43, 6 }
  0xdf   :  { %v134_v27 = vpop.f32.mrb[2].mxu0  ;;  %v1283_v58 = vrot.slane %v161_v47, 6  ;;  %v2491_v5 = vpop.f32.mrb[2].mxu1 }
  0xe0   :  { %v136_v28 = vpop.f32.mrb[3].mxu0  ;;  %v135_v49 = vadd.f32 %v134_v27, %v31_v31  ;;  %v229_v6 = vpop.f32.mrb[3].mxu1  ;;  %v235_v10 = vadd.f32 %v2491_v5, %v39_v7 }
  0xe1   :  { %v137_v30 = vadd.f32 %v136_v28, %v35_v25  ;;  %v230_v11 = vadd.f32 %v229_v6, %v39_v7 }
  0xe2   :  { %v259_v14 = vmax.f32 %v235_v10, 0.0 }
  0xe3   :  { %v2747_v32 = vpack.c.bf16 %v137_v30, %v131_v29  ;;  %v140_v33 = vpop.f32.mrb[4].mxu0  ;;  %v2818_v34 = vpack.i.bf16 %v137_v30, %v131_v29  ;;  %v2494_v8 = vpop.f32.mrb[4].mxu1  ;;  %v258_v15 = vmax.f32 %v230_v11, 0.0 }
  0xe4   :  { %v142_v36 = vpop.f32.mrb[5].mxu0  ;;  %v141_v38 = vadd.f32 %v140_v33, %v31_v31  ;;  %v239_v9 = vpop.f32.mrb[5].mxu1  ;;  %v245_v12 = vadd.f32 %v2494_v8, %v39_v7 }
  0xe5   :  { %2819 = vrot.lane.b32.xlu1 %v2818_v34, %s2972_s2  ;;  %2814 = vrot.lane.b32.xlu0 %v2818_v34, %s2973_s9  ;;  %v143_v37 = vadd.f32 %v142_v36, %v35_v25  ;;  %v240_v13 = vadd.f32 %v239_v9, %v39_v7  ;;  %v2843_v18 = vpack.i.bf16 %v259_v14, %v258_v15 }
  0xe6   :  { %2749 = vmatpush3.bf16.xpose.msk.msra.mxu1 %vm3071_vm3, %v2747_v32  ;;  %v1268_v44 = vrot.slane %v141_v38, 6  ;;  %v261_v19 = vmax.f32 %v245_v12, 0.0  ;;  %v2751_v28 = vpack.c.bf16 %v259_v14, %v258_v15 }
  0xe7   :  { %v146_v40 = vpop.f32.mrb[6].mxu0  ;;  %2502 = vmatprep.subr.mxu1 %v2969_v3  ;;  %v1278_v46 = vrot.slane %v143_v37, 6  ;;  %v3153_v17 = vmax.f32 %v240_v13, 0.0  ;;  %v2497_v20 = vpop.f32.mrb[6].mxu1 }
  0xe8   :  { %v147_v41 = vadd.f32 %v146_v40, %v31_v31  ;;  %v148_v42 = vpop.f32.mrb[7].mxu0  ;;  %v255_v21 = vadd.f32 %v2497_v20, %v39_v7  ;;  %v249_v22 = vpop.f32.mrb[7].mxu1  ;;  %v1417_v24 = vrot.slane %v261_v19, 6  ;;  %2752 = vmatpush3.bf16.msra.mxu0 %v2751_v28 }
  0xe9   :  { %504 = vrot.lane.b32.xlu0 %v143_v37, %s2973_s9  ;;  %494 = vrot.lane.b32.xlu1 %v129_v39, %s2973_s9  ;;  %v149_v45 = vadd.f32 %v148_v42, %v35_v25  ;;  %v250_v23 = vadd.f32 %v249_v22, %v39_v7  ;;  %v1416_v29 = vrot.slane %v3153_v17, 6 }
  0xea   :  { %v1269_v48 = vrot.slane %v147_v41, 6  ;;  %2517 = vmatprep.subr.mxu0 %v2969_v3 }
  0xeb   :  { %v1279_v50 = vrot.slane %v149_v45, 6  ;;  %v152_v51 = vpop.f32.mrb[8].mxu0  ;;  %v3173_v30 = vsel %vm1267_vm4, %v1416_v29, %v1417_v24 }
  0xec   :  { %v153_v52 = vadd.f32 %v152_v51, %v31_v31  ;;  %v154_v53 = vpop.f32.mrb[9].mxu0  ;;  %v3083_v55 = vsel %vm1267_vm4, %v1268_v44, %v1269_v48  ;;  %2518 = vmatpush3.msk.msra.mxu0 %vm410_vm5, %v3153_v17 }
  0xed   :  { %v3086_v56 = vsel %vm1267_vm4, %v1278_v46, %v1279_v50  ;;  %v155_v57 = vadd.f32 %v154_v53, %v35_v25  ;;  %496 = vrot.lane.b32.xlu0 %v135_v49, %s2973_s9  ;;  %498 = vrot.lane.b32.xlu1 %v141_v38, %s2973_s9  ;;  %v262_v25 = vmax.f32 %v250_v23, 0.0  ;;  %v263_v53 = vmax.f32 %v255_v21, 0.0 }
  0xee   :  { %v1271_v59 = vrot.slane %v153_v52, 6  ;;  %2503 = vmatpush3.xpose.msk.msra.mxu1 %vm264_vm2, %v143_v37  ;;  %2757 = vmatprep.subr.bf16.mxu0 %v2970_v16 }
  0xef   :  { %v1281_v60 = vrot.slane %v155_v57, 6  ;;  %2753 = vmatprep.subr.bf16.mxu1 %v2970_v16  ;;  %v1419_v26 = vrot.slane %v262_v25, 6 }
  0xf0   :  { %v3093_v61 = vsel %vm1267_vm4, %v1269_v48, %v1271_v59  ;;  %v3096_v62 = vsel %vm1267_vm4, %v1271_v59, %v1273_v54  ;;  %v1421_v54 = vrot.slane %v263_v53, 6 }
  0xf1   :  { %v3099_v63 = vsel %vm1267_vm4, %v1279_v50, %v1281_v60  ;;  %2505 = vmatmul.mubr.msk.f32.vlgmr.msra.gmra.mrb[8].mxu1 %vm264_vm2, %v129_v39  ;;  %745 = vrot.lane.b32.xlu0 %v143_v37, %s2972_s2  ;;  %v3104_v0 = vsel %vm1267_vm4, %v1281_v60, %v1283_v58  ;;  %v3165_v27 = vsel %vm1267_vm4, %v1417_v24, %v1419_v26 }
  0xf2   :  { %v2775_v1 = vpack.c.bf16 %v3099_v63, %v3086_v56  ;;  %2824 = vrot.lane.b32.xlu1 %v2818_v34, %s2974_s10  ;;  %2507 = vmatprep.mubr.msk.f32.mxu1 %vm2971_vm1, %v2969_v3  ;;  %v2828_v2 = vpack.i.bf16 %v3099_v63, %v3086_v56  ;;  %v3177_v31 = vpack.i.bf16 %v3165_v27, %v3173_v30 }
  0xf3   :  { %v2779_v32 = vpack.c.bf16 %v3165_v27, %v3173_v30  ;;  %v3210_v59 = vsel %vm1267_vm4, %v1419_v26, %v1421_v54 }
  0xf5   :  { %2508 = vmatmul.mubr.msk.f32.gmra.mrb[10].mxu1 %vm264_vm2, %v135_v49  ;;  %735 = vrot.lane.b32.xlu0 %v129_v39, %s2972_s2 }
  0xf6   :  { %737 = vrot.lane.b32.xlu1 %v135_v49, %s2972_s2  ;;  %2510 = vmatprep.mubr.msk.f32.mxu1 %vm2971_vm1, %v2969_v3 }
  0xf9   :  { %2511 = vmatmul.mubr.msk.f32.gmra.mrb[12].mxu1 %vm264_vm2, %v141_v38  ;;  %739 = vrot.lane.b32.xlu0 %v141_v38, %s2972_s2 }
  0xfa   :  { %984 = vrot.lane.b32.xlu1 %v143_v37, %s2974_s10  ;;  %2534 = vmatprep.mubr.msk.f32.mxu1 %vm2971_vm1, %v2969_v3 }
  0xfd   :  { %974 = vrot.lane.b32.xlu0 %v129_v39, %s2974_s10 }
  0xfe   :  { %976 = vrot.lane.b32.xlu1 %v135_v49, %s2974_s10 }
 0x101   :  { %978 = vrot.lane.b32.xlu0 %v141_v38, %s2974_s10 }
 0x102   :  { %2829 = vrot.lane.b32.xlu1 %v2828_v2, %s2973_s9 }
 0x105   :  { %1526 = vrot.lane.b32.xlu0 %v3104_v0, %s2973_s9 }
 0x106   :  { %2834 = vrot.lane.b32.xlu1 %v2828_v2, %s2972_s2 }
 0x109   :  { %1516 = vrot.lane.b32.xlu0 %v3083_v55, %s2973_s9 }
 0x10a   :  { %1518 = vrot.lane.b32.xlu1 %v3093_v61, %s2973_s9 }
 0x10d   :  { %1520 = vrot.lane.b32.xlu0 %v3096_v62, %s2973_s9 }
 0x10e   :  { %1765 = vrot.lane.b32.xlu1 %v3104_v0, %s2972_s2 }
 0x111   :  { %2839 = vrot.lane.b32.xlu0 %v2828_v2, %s2974_s10 }
 0x112   :  { %1755 = vrot.lane.b32.xlu1 %v3083_v55, %s2972_s2 }
 0x115   :  { %1757 = vrot.lane.b32.xlu0 %v3093_v61, %s2972_s2 }
 0x116   :  { %1759 = vrot.lane.b32.xlu1 %v3096_v62, %s2972_s2 }
 0x119   :  { %2004 = vrot.lane.b32.xlu0 %v3104_v0, %s2974_s10 }
 0x11a   :  { %1994 = vrot.lane.b32.xlu1 %v3083_v55, %s2974_s10 }
 0x11d   :  { %1996 = vrot.lane.b32.xlu0 %v3093_v61, %s2974_s10 }
 0x11e   :  { %1998 = vrot.lane.b32.xlu1 %v3096_v62, %s2974_s10 }
 0x121   :  { %640 = vrot.lane.b32.xlu0 %v3153_v17, %s2973_s9 }
 0x122   :  { %2844 = vrot.lane.b32.xlu1 %v2843_v18, %s2973_s9 }
 0x125   :  { %2849 = vrot.lane.b32.xlu0 %v2843_v18, %s2972_s2 }
 0x126   :  { %879 = vrot.lane.b32.xlu1 %v3153_v17, %s2972_s2 }
 0x129   :  { %2854 = vrot.lane.b32.xlu0 %v2843_v18, %s2974_s10 }
 0x157   :  { %v2815_v33 = vpop.permute.xlu0 %2814  ;;  %v2820_v37 = vpop.permute.xlu1 %2819 }
 0x158   :  { %v2817_v34 = vunpack.i.h.bf16 %v2815_v33  ;;  %v2816_v36 = vunpack.i.l.bf16 %v2815_v33  ;;  %v2822_v41 = vunpack.i.h.bf16 %v2820_v37  ;;  %v2821_v42 = vunpack.i.l.bf16 %v2820_v37 }
 0x15a   :  { %v2754_v38 = vpack.c.bf16 %v2817_v34, %v2816_v36  ;;  %v2761_v45 = vpack.c.bf16 %v2822_v41, %v2821_v42 }
 0x15b   :  { %v505_v39 = vpop.permute.xlu0 %504  ;;  %v495_v40 = vpop.permute.xlu1 %494 }
 0x15c   :  { %2756 = vmatpush3.bf16.xpose.msk.msra.mxu1 %vm3071_vm3, %v2754_v38 }
 0x15d   :  { %2532 = vmatprep.subr.mxu1 %v2969_v3 }
 0x15f   :  { %v497_v43 = vpop.permute.xlu0 %496  ;;  %v499_v44 = vpop.permute.xlu1 %498 }
 0x163   :  { %v746_v46 = vpop.permute.xlu0 %745 }
 0x164   :  { %2533 = vmatpush3.xpose.msk.msra.mxu1 %vm264_vm2, %v505_v39  ;;  %v2825_v47 = vpop.permute.xlu1 %2824 }
 0x165   :  { %2760 = vmatprep.subr.bf16.mxu1 %v2970_v16  ;;  %v2827_v48 = vunpack.i.h.bf16 %v2825_v47  ;;  %v2826_v49 = vunpack.i.l.bf16 %v2825_v47 }
 0x167   :  { %2535 = vmatmul.mubr.msk.f32.vlgmr.msra.gmra.mrb[14].mxu1 %vm264_vm2, %v495_v40  ;;  %v736_v50 = vpop.permute.xlu0 %735  ;;  %v2768_v52 = vpack.c.bf16 %v2827_v48, %v2826_v49 }
 0x168   :  { %2763 = vmatpush3.bf16.xpose.msk.msra.mxu1 %vm3071_vm3, %v2761_v45  ;;  %2537 = vmatprep.mubr.msk.f32.mxu1 %vm2971_vm1, %v2969_v3  ;;  %v738_v51 = vpop.permute.xlu1 %737 }
 0x169   :  { %2562 = vmatprep.subr.mxu1 %v2969_v3 }
 0x16b   :  { %2538 = vmatmul.mubr.msk.f32.gmra.mrb[16].mxu1 %vm264_vm2, %v497_v43  ;;  %v740_v57 = vpop.permute.xlu0 %739 }
 0x16c   :  { %2540 = vmatprep.mubr.msk.f32.mxu1 %vm2971_vm1, %v2969_v3  ;;  %v985_v58 = vpop.permute.xlu1 %984 }
 0x16f   :  { %2541 = vmatmul.mubr.msk.f32.gmra.mrb[18].mxu1 %vm264_vm2, %v499_v44  ;;  %v975_v60 = vpop.permute.xlu0 %974 }
 0x170   :  { %2563 = vmatpush3.xpose.msk.msra.mxu1 %vm264_vm2, %v746_v46  ;;  %2564 = vmatprep.mubr.msk.f32.mxu1 %vm2971_vm1, %v2969_v3  ;;  %v977_v2 = vpop.permute.xlu1 %976 }
 0x171   :  { %2767 = vmatprep.subr.bf16.mxu1 %v2970_v16 }
 0x173   :  { %2565 = vmatmul.mubr.msk.f32.vlgmr.msra.gmra.mrb[20].mxu1 %vm264_vm2, %v736_v50  ;;  %v979_v4 = vpop.permute.xlu0 %978 }
 0x174   :  { %2770 = vmatpush3.bf16.xpose.msk.msra.mxu1 %vm3071_vm3, %v2768_v52  ;;  %2567 = vmatprep.mubr.msk.f32.mxu1 %vm2971_vm1, %v2969_v3  ;;  %v2830_v5 = vpop.permute.xlu1 %2829 }
 0x175   :  { %2592 = vmatprep.subr.mxu1 %v2969_v3  ;;  %v2832_v6 = vunpack.i.h.bf16 %v2830_v5  ;;  %v2831_v7 = vunpack.i.l.bf16 %v2830_v5 }
 0x177   :  { %2568 = vmatmul.mubr.msk.f32.gmra.mrb[22].mxu1 %vm264_vm2, %v738_v51  ;;  %v1527_v56 = vpop.permute.xlu0 %1526  ;;  %v2782_v63 = vpack.c.bf16 %v2832_v6, %v2831_v7 }
 0x178   :  { %2570 = vmatprep.mubr.msk.f32.mxu1 %vm2971_vm1, %v2969_v3 }
 0x17b   :  { %2571 = vmatmul.mubr.msk.f32.gmra.mrb[24].mxu1 %vm264_vm2, %v740_v57 }
 0x17c   :  { %2593 = vmatpush3.xpose.msk.msra.mxu1 %vm264_vm2, %v985_v58  ;;  %2594 = vmatprep.mubr.msk.f32.mxu1 %vm2971_vm1, %v2969_v3 }
 0x17d   :  { %2774 = vmatprep.subr.bf16.mxu1 %v2970_v16 }
 0x17f   :  { %2595 = vmatmul.mubr.msk.f32.vlgmr.msra.gmra.mrb[26].mxu1 %vm264_vm2, %v975_v60 }
 0x180   :  { %2777 = vmatpush3.bf16.xpose.msk.msra.mxu1 %vm3071_vm3, %v2775_v1  ;;  %2597 = vmatprep.mubr.msk.f32.mxu1 %vm2971_vm1, %v2969_v3  ;;  %v2835_v1 = vpop.permute.xlu1 %2834 }
 0x181   :  { %2622 = vmatprep.subr.mxu1 %v2969_v3  ;;  %v2837_v8 = vunpack.i.h.bf16 %v2835_v1  ;;  %v2836_v9 = vunpack.i.l.bf16 %v2835_v1 }
 0x183   :  { %2598 = vmatmul.mubr.msk.f32.gmra.mrb[28].mxu1 %vm264_vm2, %v977_v2  ;;  %v2789_v10 = vpack.c.bf16 %v2837_v8, %v2836_v9 }
 0x184   :  { %2600 = vmatprep.mubr.msk.f32.mxu1 %vm2971_vm1, %v2969_v3  ;;  %v1519_v11 = vpop.permute.xlu1 %1518 }
 0x187   :  { %2601 = vmatmul.mubr.msk.f32.gmra.mrb[30].mxu1 %vm264_vm2, %v979_v4 }
 0x188   :  { %2623 = vmatpush3.xpose.msk.msra.mxu1 %vm264_vm2, %v3104_v0  ;;  %2624 = vmatprep.mubr.msk.f32.mxu1 %vm2971_vm1, %v2969_v3  ;;  %v1517_v0 = vpop.permute.xlu0 %1516 }
 0x189   :  { %2781 = vmatprep.subr.bf16.mxu1 %v2970_v16 }
 0x18b   :  { %2625 = vmatmul.mubr.msk.f32.vlgmr.msra.gmra.mrb[32].mxu1 %vm264_vm2, %v3083_v55 }
 0x18c   :  { %2784 = vmatpush3.bf16.xpose.msk.msra.mxu1 %vm3071_vm3, %v2782_v63  ;;  %2627 = vmatprep.mubr.msk.f32.mxu1 %vm2971_vm1, %v2969_v3  ;;  %v1521_v55 = vpop.permute.xlu0 %1520 }
 0x18d   :  { %2652 = vmatprep.subr.mxu1 %v2969_v3 }
 0x18f   :  { %2628 = vmatmul.mubr.msk.f32.gmra.mrb[34].mxu1 %vm264_vm2, %v3093_v61 }
 0x190   :  { %2630 = vmatprep.mubr.msk.f32.mxu1 %vm2971_vm1, %v2969_v3  ;;  %v2840_v61 = vpop.permute.xlu0 %2839 }
 0x191   :  { %v2842_v12 = vunpack.i.h.bf16 %v2840_v61  ;;  %v2841_v13 = vunpack.i.l.bf16 %v2840_v61 }
 0x193   :  { %2631 = vmatmul.mubr.msk.f32.gmra.mrb[36].mxu1 %vm264_vm2, %v3096_v62  ;;  %v1766_v62 = vpop.permute.xlu1 %1765  ;;  %v2796_v14 = vpack.c.bf16 %v2842_v12, %v2841_v13 }
 0x194   :  { %2653 = vmatpush3.xpose.msk.msra.mxu1 %vm264_vm2, %v1527_v56  ;;  %2654 = vmatprep.mubr.msk.f32.mxu1 %vm2971_vm1, %v2969_v3  ;;  %v1758_v18 = vpop.permute.xlu0 %1757 }
 0x195   :  { %2788 = vmatprep.subr.bf16.mxu1 %v2970_v16 }
 0x197   :  { %2655 = vmatmul.mubr.msk.f32.vlgmr.msra.gmra.mrb[38].mxu1 %vm264_vm2, %v1517_v0  ;;  %v1756_v15 = vpop.permute.xlu1 %1755 }
 0x198   :  { %2791 = vmatpush3.bf16.xpose.msk.msra.mxu1 %vm3071_vm3, %v2789_v10  ;;  %2657 = vmatprep.mubr.msk.f32.mxu1 %vm2971_vm1, %v2969_v3  ;;  %v2005_v20 = vpop.permute.xlu0 %2004 }
 0x199   :  { %2682 = vmatprep.subr.mxu1 %v2969_v3 }
 0x19b   :  { %2658 = vmatmul.mubr.msk.f32.gmra.mrb[40].mxu1 %vm264_vm2, %v1519_v11  ;;  %v1760_v19 = vpop.permute.xlu1 %1759 }
 0x19c   :  { %2660 = vmatprep.mubr.msk.f32.mxu1 %vm2971_vm1, %v2969_v3  ;;  %v1997_v21 = vpop.permute.xlu0 %1996 }
 0x19f   :  { %2661 = vmatmul.mubr.msk.f32.gmra.mrb[42].mxu1 %vm264_vm2, %v1521_v55  ;;  %v1995_v35 = vpop.permute.xlu1 %1994 }
 0x1a0   :  { %2683 = vmatpush3.xpose.msk.msra.mxu1 %vm264_vm2, %v1766_v62  ;;  %2684 = vmatprep.mubr.msk.f32.mxu1 %vm2971_vm1, %v2969_v3 }
 0x1a1   :  { %2795 = vmatprep.subr.bf16.mxu1 %v2970_v16 }
 0x1a3   :  { %2685 = vmatmul.mubr.msk.f32.vlgmr.msra.gmra.mrb[44].mxu1 %vm264_vm2, %v1756_v15  ;;  %v1999_v22 = vpop.permute.xlu1 %1998 }
 0x1a4   :  { %2798 = vmatpush3.bf16.xpose.msk.msra.mxu1 %vm3071_vm3, %v2796_v14  ;;  %2687 = vmatprep.mubr.msk.f32.mxu1 %vm2971_vm1, %v2969_v3 }
 0x1a5   :  { %2712 = vmatprep.subr.mxu1 %v2969_v3 }
 0x1a7   :  { %2688 = vmatmul.mubr.msk.f32.gmra.mrb[46].mxu1 %vm264_vm2, %v1758_v18 }
 0x1a8   :  { %2690 = vmatprep.mubr.msk.f32.mxu1 %vm2971_vm1, %v2969_v3 }
 0x1ab   :  { %2691 = vmatmul.mubr.msk.f32.gmra.mrb[48].mxu1 %vm264_vm2, %v1760_v19 }
 0x1ac   :  { %2713 = vmatpush3.xpose.msk.msra.mxu1 %vm264_vm2, %v2005_v20  ;;  %2714 = vmatprep.mubr.msk.f32.mxu1 %vm2971_vm1, %v2969_v3  ;;  %v3336_v20 = vpop.permute.xlu0 %640 }
 0x1af   :  { %2715 = vmatmul.mubr.msk.f32.vlgmr.msra.gmra.mrb[50].mxu1 %vm264_vm2, %v1995_v35 }
 0x1b0   :  { %2717 = vmatprep.mubr.msk.f32.mxu1 %vm2971_vm1, %v2969_v3 }
 0x1b3   :  { %2718 = vmatmul.mubr.msk.f32.gmra.mrb[52].mxu1 %vm264_vm2, %v1997_v21 }
 0x1b4   :  { %2720 = vmatprep.mubr.msk.f32.mxu1 %vm2971_vm1, %v2969_v3 }
 0x1b7   :  { %2721 = vmatmul.mubr.msk.f32.gmra.mrb[54].mxu1 %vm264_vm2, %v1999_v22 }
 0x1c4   :  { %v349_v23 = vpop.f32.mrb[8].mxu1 }
 0x1c5   :  { %v3286_v24 = vmul.f32 0.35355338, %v349_v23  ;;  %v2506_v25 = vpop.f32.mrb[9].mxu1 }
 0x1c6   :  { %v3338_v25 = vpop.permute.xlu0 %2849 }
 0x1c7   :  { %v367_v26 = vsel %vm366_vm6, %v3286_v24, -inf }
 0x1c8   :  { %368 = vmax.xlane.f32.xlu0 %v367_v26  ;;  %v354_v28 = vpop.f32.mrb[10].mxu1 }
 0x1c9   :  { %v3290_v29 = vmul.f32 0.35355338, %v354_v28  ;;  %v2509_v33 = vpop.f32.mrb[11].mxu1 }
 0x1ca   :  { %v3340_v33 = vpop.permute.xlu0 %2854 }
 0x1cb   :  { %v370_v34 = vsel %vm366_vm6, %v3290_v29, -inf }
 0x1cc   :  { %371 = vmax.xlane.f32.xlu1 %v370_v34  ;;  %v359_v36 = vpop.f32.mrb[12].mxu1 }
 0x1cd   :  { %v3294_v37 = vmul.f32 0.35355338, %v359_v36  ;;  %v2512_v38 = vpop.f32.mrb[13].mxu1 }
 0x1cf   :  { %v374_v39 = vsel %vm373_vm7, %v3294_v37, -inf }
 0x1d0   :  { %375 = vmax.xlane.f32.xlu0 %v374_v39 }
 0x23a   :  { %v584_v40 = vpop.f32.mrb[14].mxu1 }
 0x23b   :  { %v3298_v41 = vmul.f32 0.35355338, %v584_v40  ;;  %v2536_v42 = vpop.f32.mrb[15].mxu1 }
 0x23d   :  { %v601_v43 = vsel %vm366_vm6, %v3298_v41, -inf }
 0x23e   :  { %602 = vmax.xlane.f32.xlu0 %v601_v43  ;;  %v589_v44 = vpop.f32.mrb[16].mxu1 }
 0x23f   :  { %v3302_v45 = vmul.f32 0.35355338, %v589_v44  ;;  %v2539_v46 = vpop.f32.mrb[17].mxu1 }
 0x241   :  { %v604_v47 = vsel %vm366_vm6, %v3302_v45, -inf }
 0x242   :  { %605 = vmax.xlane.f32.xlu1 %v604_v47  ;;  %v594_v48 = vpop.f32.mrb[18].mxu1 }
 0x243   :  { %v3306_v49 = vmul.f32 0.35355338, %v594_v48  ;;  %v2542_v50 = vpop.f32.mrb[19].mxu1 }
 0x245   :  { %v607_v51 = vsel %vm373_vm7, %v3306_v49, -inf }
 0x246   :  { %608 = vmax.xlane.f32.xlu0 %v607_v51  ;;  %v825_v52 = vpop.f32.mrb[20].mxu1 }
 0x247   :  { %v3310_v53 = vmul.f32 0.35355338, %v825_v52  ;;  %v2566_v54 = vpop.f32.mrb[21].mxu1 }
 0x249   :  { %v842_v57 = vsel %vm366_vm6, %v3310_v53, -inf }
 0x24a   :  { %843 = vmax.xlane.f32.xlu1 %v842_v57  ;;  %v830_v58 = vpop.f32.mrb[22].mxu1 }
 0x24b   :  { %v3314_v60 = vmul.f32 0.35355338, %v830_v58  ;;  %v2569_v2 = vpop.f32.mrb[23].mxu1 }
 0x24d   :  { %v845_v4 = vsel %vm366_vm6, %v3314_v60, -inf }
 0x24e   :  { %846 = vmax.xlane.f32.xlu0 %v845_v4  ;;  %v835_v5 = vpop.f32.mrb[24].mxu1 }
 0x24f   :  { %v3318_v6 = vmul.f32 0.35355338, %v835_v5  ;;  %v2572_v7 = vpop.f32.mrb[25].mxu1 }
 0x251   :  { %v848_v56 = vsel %vm373_vm7, %v3318_v6, -inf }
 0x252   :  { %849 = vmax.xlane.f32.xlu1 %v848_v56  ;;  %v1064_v63 = vpop.f32.mrb[26].mxu1 }
 0x253   :  { %v3322_v1 = vmul.f32 0.35355338, %v1064_v63  ;;  %v2596_v0 = vpop.f32.mrb[27].mxu1 }
 0x255   :  { %v1081_v8 = vsel %vm366_vm6, %v3322_v1, -inf  ;;  %v369_v38 = vpop.xlane.xlu0 %368 }
 0x256   :  { %1082 = vmax.xlane.f32.xlu0 %v1081_v8  ;;  %v1069_v9 = vpop.f32.mrb[28].mxu1  ;;  %v377_v42 = vsub.f32 %v3286_v24, %v369_v38 }
 0x257   :  { %v2599_v55 = vpop.f32.mrb[29].mxu1  ;;  %v3350_v54 = vmul.f32 0.35355338, %v1069_v9 }
 0x258   :  { %v380_v47 = vmul.f32 1.442695, %v377_v42 }
 0x259   :  { %v1084_v56 = vsel %vm366_vm6, %v3350_v54, -inf }
 0x25a   :  { %v1074_v10 = vpop.f32.mrb[30].mxu1  ;;  %2873 = vpow2.f32 %v380_v47 }
 0x25b   :  { %v3326_v11 = vmul.f32 0.35355338, %v1074_v10  ;;  %v2602_v61 = vpop.f32.mrb[31].mxu1 }
 0x25d   :  { %v1087_v62 = vsel %vm373_vm7, %v3326_v11, -inf  ;;  %v376_v57 = vpop.xlane.xlu0 %375 }
 0x25e   :  { %1088 = vmax.xlane.f32.xlu0 %v1087_v62  ;;  %v1363_v12 = vpop.f32.mrb[32].mxu1  ;;  %v379_v4 = vsub.f32 %v3294_v37, %v376_v57 }
 0x25f   :  { %v2626_v13 = vpop.f32.mrb[33].mxu1  ;;  %v3353_v5 = vmul.f32 0.35355338, %v1363_v12 }
 0x260   :  { %v384_v0 = vmul.f32 1.442695, %v379_v4 }
 0x262   :  { %v1368_v14 = vpop.f32.mrb[34].mxu1 }
 0x263   :  { %v3330_v15 = vmul.f32 0.35355338, %v1368_v14  ;;  %1118 = vrot.lane.b32.xlu1 %v3153_v17, %s2974_s10  ;;  %v2629_v18 = vpop.f32.mrb[35].mxu1  ;;  %v3342_v17 = vpop.permute.xlu1 %2844 }
 0x264   :  { %v3359_v9 = vpop.eup %2873 }
 0x265   :  { %v1383_v19 = vsel %vm366_vm6, %v3330_v15, -inf  ;;  %v386_v10 = vsel %vm366_vm6, %v3359_v9, 0.0 }
 0x266   :  { %1384 = vmax.xlane.f32.xlu0 %v1383_v19  ;;  %v1373_v35 = vpop.f32.mrb[36].mxu1 }
 0x267   :  { %v2632_v21 = vpop.f32.mrb[37].mxu1  ;;  %v3345_v43 = vpop.permute.xlu1 %879  ;;  %v3361_v37 = vmul.f32 0.35355338, %v1373_v35 }
 0x269   :  { %v1386_v61 = vsel %vm373_vm7, %v3361_v37, -inf }
 0x26a   :  { %v1606_v22 = vpop.f32.mrb[38].mxu1 }
 0x26b   :  { %v2656_v23 = vpop.f32.mrb[39].mxu1  ;;  %v372_v48 = vpop.xlane.xlu1 %371  ;;  %v3369_v12 = vmul.f32 0.35355338, %v1606_v22 }
 0x26c   :  { %v378_v52 = vsub.f32 %v3290_v29, %v372_v48  ;;  %v1380_v29 = vsel %vm366_vm6, %v3353_v5, -inf }
 0x26d   :  { %v1623_v21 = vsel %vm366_vm6, %v3369_v12, -inf }
 0x26e   :  { %v1611_v26 = vpop.f32.mrb[40].mxu1  ;;  %v382_v24 = vmul.f32 1.442695, %v378_v52 }
 0x26f   :  { %v2659_v28 = vpop.f32.mrb[41].mxu1  ;;  %v3375_v18 = vmul.f32 0.35355338, %v1611_v26 }
 0x270   :  { %2875 = vpow2.f32 %v382_v24 }
 0x271   :  { %2877 = vpow2.f32 %v384_v0  ;;  %v1626_v28 = vsel %vm366_vm6, %v3375_v18, -inf }
 0x272   :  { %v1616_v34 = vpop.f32.mrb[42].mxu1 }
 0x273   :  { %v2662_v36 = vpop.f32.mrb[43].mxu1  ;;  %v3377_v19 = vmul.f32 0.35355338, %v1616_v34 }
 0x275   :  { %v1629_v26 = vsel %vm373_vm7, %v3377_v19, -inf }
 0x276   :  { %v1845_v39 = vpop.f32.mrb[44].mxu1 }
 0x277   :  { %v2686_v40 = vpop.f32.mrb[45].mxu1  ;;  %v3383_v22 = vmul.f32 0.35355338, %v1845_v39 }
 0x279   :  { %v1862_v38 = vsel %vm366_vm6, %v3383_v22, -inf }
 0x27a   :  { %v1850_v44 = vpop.f32.mrb[46].mxu1  ;;  %v3367_v62 = vpop.eup %2875 }
 0x27b   :  { %v2689_v46 = vpop.f32.mrb[47].mxu1  ;;  %v389_v13 = vsel %vm366_vm6, %v3367_v62, 0.0  ;;  %v3373_v14 = vpop.eup %2877  ;;  %v3385_v23 = vmul.f32 0.35355338, %v1850_v44 }
 0x27c   :  { %2859 = vrot.lane.b32.xlu0 %v3177_v31, %s2973_s9  ;;  %v392_v35 = vsel %vm373_vm7, %v3373_v14, 0.0 }
 0x27d   :  { %v1865_v39 = vsel %vm366_vm6, %v3385_v23, -inf }
 0x27e   :  { %v1855_v50 = vpop.f32.mrb[48].mxu1 }
 0x27f   :  { %v2692_v51 = vpop.f32.mrb[49].mxu1  ;;  %v3391_v34 = vmul.f32 0.35355338, %v1855_v50 }
 0x281   :  { %v1868_v42 = vsel %vm373_vm7, %v3391_v34, -inf }
 0x282   :  { %v2084_v58 = vpop.f32.mrb[50].mxu1 }
 0x283   :  { %v2716_v2 = vpop.f32.mrb[51].mxu1  ;;  %v3393_v36 = vmul.f32 0.35355338, %v2084_v58 }
 0x285   :  { %v2101_v44 = vsel %vm366_vm6, %v3393_v36, -inf }
 0x286   :  { %v2089_v7 = vpop.f32.mrb[52].mxu1 }
 0x287   :  { %1085 = vmax.xlane.f32.xlu1 %v1084_v56  ;;  %v2719_v63 = vpop.f32.mrb[53].mxu1  ;;  %v3399_v40 = vmul.f32 0.35355338, %v2089_v7 }
 0x289   :  { %v2104_v47 = vsel %vm366_vm6, %v3399_v40, -inf }
 0x28a   :  { %v2094_v8 = vpop.f32.mrb[54].mxu1 }
 0x28b   :  { %1381 = vmax.xlane.f32.xlu1 %v1380_v29  ;;  %v2722_v55 = vpop.f32.mrb[55].mxu1  ;;  %v3405_v46 = vmul.f32 0.35355338, %v2094_v8 }
 0x28d   :  { %v2107_v48 = vsel %vm373_vm7, %v3405_v46, -inf }
 0x28f   :  { %387 = vadd.xlane.f32.xlu1 %v386_v10 }
 0x293   :  { %1387 = vmax.xlane.f32.xlu1 %v1386_v61 }
 0x297   :  { %390 = vadd.xlane.f32.xlu1 %v389_v13 }
 0x29b   :  { %393 = vadd.xlane.f32.xlu1 %v392_v35  ;;  %1624 = vmax.xlane.f32.xlu0 %v1623_v21 }
 0x29f   :  { %1627 = vmax.xlane.f32.xlu1 %v1626_v28  ;;  %1630 = vmax.xlane.f32.xlu0 %v1629_v26 }
 0x2a3   :  { %1863 = vmax.xlane.f32.xlu1 %v1862_v38  ;;  %1866 = vmax.xlane.f32.xlu0 %v1865_v39 }
 0x2a7   :  { %1869 = vmax.xlane.f32.xlu1 %v1868_v42  ;;  %2102 = vmax.xlane.f32.xlu0 %v2101_v44 }
 0x2ab   :  { %2105 = vmax.xlane.f32.xlu0 %v2104_v47 }
 0x2af   :  { %2108 = vmax.xlane.f32.xlu0 %v2107_v48 }
 0x2cb   :  { %v603_v50 = vpop.xlane.xlu0 %602 }
 0x2cc   :  { %v610_v51 = vsub.f32 %v3298_v41, %v603_v50 }
 0x2ce   :  { %v613_v52 = vmul.f32 1.442695, %v610_v51 }
 0x2cf   :  { %v606_v57 = vpop.xlane.xlu1 %605 }
 0x2d0   :  { %2879 = vpow2.f32 %v613_v52  ;;  %v611_v58 = vsub.f32 %v3302_v45, %v606_v57 }
 0x2d2   :  { %v615_v2 = vmul.f32 1.442695, %v611_v58 }
 0x2d3   :  { %v609_v24 = vpop.xlane.xlu0 %608 }
 0x2d4   :  { %2881 = vpow2.f32 %v615_v2  ;;  %v612_v4 = vsub.f32 %v3306_v49, %v609_v24 }
 0x2d6   :  { %v617_v7 = vmul.f32 1.442695, %v612_v4 }
 0x2d7   :  { %v844_v56 = vpop.xlane.xlu1 %843 }
 0x2d8   :  { %2883 = vpow2.f32 %v617_v7  ;;  %v851_v63 = vsub.f32 %v3310_v53, %v844_v56 }
 0x2da   :  { %v3415_v0 = vpop.eup %2879  ;;  %v854_v8 = vmul.f32 1.442695, %v851_v63 }
 0x2db   :  { %v847_v29 = vpop.xlane.xlu0 %846  ;;  %v619_v41 = vsel %vm366_vm6, %v3415_v0, 0.0 }
 0x2dc   :  { %2885 = vpow2.f32 %v854_v8  ;;  %v852_v45 = vsub.f32 %v3314_v60, %v847_v29  ;;  %620 = vadd.xlane.f32.xlu0 %v619_v41 }
 0x2de   :  { %v3420_v55 = vpop.eup %2881  ;;  %v856_v10 = vmul.f32 1.442695, %v852_v45 }
 0x2df   :  { %v850_v49 = vpop.xlane.xlu1 %849  ;;  %v622_v61 = vsel %vm366_vm6, %v3420_v55, 0.0 }
 0x2e0   :  { %2887 = vpow2.f32 %v856_v10  ;;  %v853_v53 = vsub.f32 %v3318_v6, %v850_v49  ;;  %623 = vadd.xlane.f32.xlu1 %v622_v61 }
 0x2e2   :  { %v3425_v13 = vpop.eup %2883  ;;  %v858_v35 = vmul.f32 1.442695, %v853_v53 }
 0x2e3   :  { %v1083_v21 = vpop.xlane.xlu0 %1082  ;;  %v625_v28 = vsel %vm373_vm7, %v3425_v13, 0.0  ;;  %v3456_v56 = vpop.permute.xlu1 %1118 }
 0x2e4   :  { %2889 = vpow2.f32 %v858_v35  ;;  %v1090_v60 = vsub.f32 %v3322_v1, %v1083_v21  ;;  %626 = vadd.xlane.f32.xlu0 %v625_v28  ;;  %v2847_v35 = vunpack.i.h.bf16 %v3342_v17 }
 0x2e6   :  { %v3430_v26 = vpop.eup %2885  ;;  %v1093_v38 = vmul.f32 1.442695, %v1090_v60 }
 0x2e7   :  { %v860_v39 = vsel %vm366_vm6, %v3430_v26, 0.0 }
 0x2e8   :  { %2891 = vpow2.f32 %v1093_v38  ;;  %861 = vadd.xlane.f32.xlu1 %v860_v39 }
 0x2ea   :  { %v3434_v6 = vpop.eup %2887 }
 0x2eb   :  { %v1089_v42 = vpop.xlane.xlu0 %1088  ;;  %v863_v44 = vsel %vm366_vm6, %v3434_v6, 0.0 }
 0x2ec   :  { %v1092_v47 = vsub.f32 %v3326_v11, %v1089_v42  ;;  %864 = vadd.xlane.f32.xlu0 %v863_v44 }
 0x2ee   :  { %v3439_v48 = vpop.eup %2889  ;;  %v1097_v1 = vmul.f32 1.442695, %v1092_v47 }
 0x2ef   :  { %v866_v50 = vsel %vm373_vm7, %v3439_v48, 0.0 }
 0x2f0   :  { %2893 = vpow2.f32 %v1097_v1  ;;  %867 = vadd.xlane.f32.xlu0 %v866_v50 }
 0x2f2   :  { %v3443_v51 = vpop.eup %2891 }
 0x2f3   :  { %v1385_v52 = vpop.xlane.xlu0 %1384  ;;  %v1099_v57 = vsel %vm366_vm6, %v3443_v51, 0.0 }
 0x2f4   :  { %v1390_v58 = vsub.f32 %v3330_v15, %v1385_v52  ;;  %1100 = vadd.xlane.f32.xlu0 %v1099_v57 }
 0x2f6   :  { %v1394_v2 = vmul.f32 1.442695, %v1390_v58 }
 0x2f7   :  { %v3465_v49 = vpop.permute.xlu0 %2859 }
 0x2f8   :  { %2895 = vpow2.f32 %v1394_v2 }
 0x2fa   :  { %v3448_v11 = vpop.eup %2893 }
 0x2fb   :  { %v1105_v24 = vsel %vm373_vm7, %v3448_v11, 0.0 }
 0x2fc   :  { %1106 = vadd.xlane.f32.xlu0 %v1105_v24 }
 0x302   :  { %v3452_v4 = vpop.eup %2895 }
 0x303   :  { %v1401_v7 = vsel %vm366_vm6, %v3452_v4, 0.0 }
 0x304   :  { %1402 = vadd.xlane.f32.xlu0 %v1401_v7 }
 0x314   :  { %v1086_v63 = vpop.xlane.xlu1 %1085 }
 0x315   :  { %v1091_v15 = vsub.f32 %v3350_v54, %v1086_v63  ;;  %v2846_v54 = vunpack.i.l.bf16 %v3342_v17 }
 0x317   :  { %v1095_v8 = vmul.f32 1.442695, %v1091_v15  ;;  %v2758_v42 = vpack.c.bf16 %v2847_v35, %v2846_v54 }
 0x318   :  { %v3459_v29 = vpop.xlane.xlu1 %1381 }
 0x319   :  { %2897 = vpow2.f32 %v1095_v8 }
 0x31c   :  { %v388_v41 = vpop.xlane.xlu1 %387 }
 0x31d   :  { %2899 = vrcp.f32 %v388_v41 }
 0x320   :  { %v3461_v45 = vpop.xlane.xlu1 %1387 }
 0x323   :  { %v3463_v10 = vpop.eup %2897 }
 0x324   :  { %v391_v61 = vpop.xlane.xlu1 %390  ;;  %v1102_v53 = vsel %vm366_vm6, %v3463_v10, 0.0 }
 0x325   :  { %1103 = vadd.xlane.f32.xlu1 %v1102_v53  ;;  %2901 = vrcp.f32 %v391_v61  ;;  %v1389_v53 = vsub.f32 %v3353_v5, %v3459_v29 }
 0x327   :  { %v2900_v21 = vpop.eup %2899 }
 0x328   :  { %v394_v28 = vpop.xlane.xlu1 %393  ;;  %v1625_v60 = vpop.xlane.xlu0 %1624  ;;  %v396_v38 = vmul.f32 %v2900_v21, %v3359_v9  ;;  %v1392_v21 = vmul.f32 1.442695, %v1389_v53 }
 0x329   :  { %2903 = vrcp.f32 %v394_v28  ;;  %v1632_v39 = vsub.f32 %v3369_v12, %v1625_v60  ;;  %v1391_v28 = vsub.f32 %v3361_v37, %v3461_v45 }
 0x32a   :  { %2520 = vmatmul.mubr.msk.f32.vlgmr.msra.gmra.mrb[10].mxu0 %vm366_vm6, %v396_v38 }
 0x32b   :  { %v1635_v44 = vmul.f32 1.442695, %v1632_v39  ;;  %2759 = vmatpush3.bf16.msra.mxu0 %v2758_v42  ;;  %2522 = vmatprep.mubr.msk.f32.mxu0 %vm2971_vm1, %v2969_v3  ;;  %v1396_v39 = vmul.f32 1.442695, %v1391_v28 }
 0x32c   :  { %v1628_v47 = vpop.xlane.xlu1 %1627  ;;  %v1631_v1 = vpop.xlane.xlu0 %1630  ;;  %2547 = vmatprep.subr.mxu0 %v2969_v3 }
 0x32d   :  { %2905 = vpow2.f32 %v1635_v44  ;;  %v1633_v17 = vsub.f32 %v3375_v18, %v1628_v47  ;;  %v1634_v42 = vsub.f32 %v3377_v19, %v1631_v1 }
 0x32f   :  { %v1637_v50 = vmul.f32 1.442695, %v1633_v17  ;;  %v2902_v9 = vpop.eup %2901  ;;  %2548 = vmatpush3.msk.msra.mxu0 %vm410_vm5, %v3336_v20  ;;  %v1639_v5 = vmul.f32 1.442695, %v1634_v42 }
 0x330   :  { %v1864_v12 = vpop.xlane.xlu1 %1863  ;;  %v1867_v52 = vpop.xlane.xlu0 %1866  ;;  %v398_v2 = vmul.f32 %v2902_v9, %v3367_v62  ;;  %2764 = vmatprep.subr.bf16.mxu0 %v2970_v16 }
 0x331   :  { %2907 = vpow2.f32 %v1637_v50  ;;  %v1871_v57 = vsub.f32 %v3383_v22, %v1864_v12  ;;  %v1872_v58 = vsub.f32 %v3385_v23, %v1867_v52 }
 0x332   :  { %2523 = vmatmul.mubr.msk.f32.gmra.mrb[12].mxu0 %vm366_vm6, %v398_v2 }
 0x333   :  { %v2904_v24 = vpop.eup %2903  ;;  %v1874_v18 = vmul.f32 1.442695, %v1871_v57  ;;  %v1876_v7 = vmul.f32 1.442695, %v1872_v58  ;;  %2525 = vmatprep.mubr.msk.f32.mxu0 %vm2971_vm1, %v2969_v3 }
 0x334   :  { %v1870_v63 = vpop.xlane.xlu1 %1869  ;;  %v400_v20 = vmul.f32 %v2904_v24, %v3373_v14  ;;  %v2103_v38 = vpop.xlane.xlu0 %2102 }
 0x335   :  { %2909 = vpow2.f32 %v1874_v18  ;;  %v1873_v22 = vsub.f32 %v3391_v34, %v1870_v63  ;;  %v2110_v29 = vsub.f32 %v3393_v36, %v2103_v38  ;;  %v2856_v38 = vunpack.i.l.bf16 %v3340_v33 }
 0x336   :  { %1660 = vrot.lane.b32.xlu1 %v3210_v59, %s2973_s9  ;;  %2911 = vpow2.f32 %v1876_v7  ;;  %2526 = vmatmul.mubr.msk.f32.gmra.mrb[14].mxu0 %vm366_vm6, %v400_v20  ;;  %v2852_v20 = vunpack.i.h.bf16 %v3338_v25 }
 0x337   :  { %v3491_v62 = vpop.eup %2905  ;;  %v1878_v23 = vmul.f32 1.442695, %v1873_v22  ;;  %2549 = vmatprep.mubr.msk.f32.mxu0 %vm2971_vm1, %v2969_v3  ;;  %v2113_v47 = vmul.f32 1.442695, %v2110_v29  ;;  %v2851_v22 = vunpack.i.l.bf16 %v3338_v25 }
 0x338   :  { %v1641_v15 = vsel %vm366_vm6, %v3491_v62, 0.0  ;;  %v2106_v44 = vpop.xlane.xlu0 %2105 }
 0x339   :  { %1642 = vadd.xlane.f32.xlu0 %v1641_v15  ;;  %2913 = vpow2.f32 %v1878_v23  ;;  %v2111_v17 = vsub.f32 %v3399_v40, %v2106_v44 }
 0x33a   :  { %2915 = vpow2.f32 %v1392_v21 }
 0x33b   :  { %v3498_v14 = vpop.eup %2907  ;;  %2917 = vpow2.f32 %v1396_v39  ;;  %v2115_v37 = vmul.f32 1.442695, %v2111_v17 }
 0x33c   :  { %v1644_v34 = vsel %vm366_vm6, %v3498_v14, 0.0  ;;  %2919 = vpow2.f32 %v1639_v5  ;;  %v2109_v12 = vpop.xlane.xlu0 %2108 }
 0x33d   :  { %1645 = vadd.xlane.f32.xlu0 %v1644_v34  ;;  %2921 = vpow2.f32 %v2113_v47  ;;  %v2112_v58 = vsub.f32 %v3405_v46, %v2109_v12  ;;  %v2765_v34 = vpack.c.bf16 %v2852_v20, %v2851_v22  ;;  %v2862_v12 = vunpack.i.h.bf16 %v3465_v49 }
 0x33e   :  { %2923 = vpow2.f32 %v2115_v37 }
 0x33f   :  { %v3502_v8 = vpop.eup %2909  ;;  %v2117_v18 = vmul.f32 1.442695, %v2112_v58 }
 0x340   :  { %v1880_v41 = vsel %vm366_vm6, %v3502_v8, 0.0  ;;  %v3506_v61 = vpop.eup %2911 }
 0x341   :  { %1881 = vadd.xlane.f32.xlu0 %v1880_v41  ;;  %v1883_v35 = vsel %vm366_vm6, %v3506_v61, 0.0 }
 0x343   :  { %v3512_v54 = vpop.eup %2913 }
 0x344   :  { %v1886_v60 = vsel %vm373_vm7, %v3512_v54, 0.0  ;;  %v3521_v50 = vpop.eup %2915 }
 0x345   :  { %1884 = vadd.xlane.f32.xlu0 %v1883_v35  ;;  %v1398_v45 = vsel %vm366_vm6, %v3521_v50, 0.0  ;;  %v3525_v9 = vpop.eup %2917 }
 0x346   :  { %v1404_v19 = vsel %vm373_vm7, %v3525_v9, 0.0  ;;  %v3529_v36 = vpop.eup %2919 }
 0x347   :  { %v1647_v40 = vsel %vm373_vm7, %v3529_v36, 0.0  ;;  %v3535_v1 = vpop.eup %2921 }
 0x348   :  { %v2119_v52 = vsel %vm366_vm6, %v3535_v1, 0.0  ;;  %v3539_v57 = vpop.eup %2923 }
 0x349   :  { %1887 = vadd.xlane.f32.xlu0 %v1886_v60  ;;  %v2122_v24 = vsel %vm366_vm6, %v3539_v57, 0.0  ;;  %v2857_v60 = vunpack.i.h.bf16 %v3340_v33 }
 0x34b   :  { %v2772_v42 = vpack.c.bf16 %v2857_v60, %v2856_v38 }
 0x35a   :  { %1399 = vadd.xlane.f32.xlu1 %v1398_v45 }
 0x35e   :  { %1405 = vadd.xlane.f32.xlu1 %v1404_v19 }
 0x35f   :  { %2864 = vrot.lane.b32.xlu0 %v3177_v31, %s2972_s2 }
 0x362   :  { %1648 = vadd.xlane.f32.xlu1 %v1647_v40 }
 0x366   :  { %2120 = vadd.xlane.f32.xlu1 %v2119_v52 }
 0x369   :  { %v621_v2 = vpop.xlane.xlu0 %620 }
 0x36a   :  { %2925 = vrcp.f32 %v621_v2  ;;  %2123 = vadd.xlane.f32.xlu1 %v2122_v24 }
 0x36d   :  { %v624_v7 = vpop.xlane.xlu1 %623 }
 0x36e   :  { %2927 = vrcp.f32 %v624_v7 }
 0x36f   :  { %2929 = vpow2.f32 %v2117_v18 }
 0x371   :  { %v627_v63 = vpop.xlane.xlu0 %626 }
 0x372   :  { %2931 = vrcp.f32 %v627_v63 }
 0x374   :  { %v2926_v23 = vpop.eup %2925 }
 0x375   :  { %v629_v15 = vmul.f32 %v2926_v23, %v3415_v0  ;;  %v862_v46 = vpop.xlane.xlu1 %861 }
 0x376   :  { %2933 = vrcp.f32 %v862_v46 }
 0x377   :  { %2550 = vmatmul.mubr.msk.f32.vlgmr.msra.gmra.mrb[16].mxu0 %vm366_vm6, %v629_v15 }
 0x378   :  { %v2928_v41 = vpop.eup %2927  ;;  %2766 = vmatpush3.bf16.msra.mxu0 %v2765_v34  ;;  %2552 = vmatprep.mubr.msk.f32.mxu0 %vm2971_vm1, %v2969_v3 }
 0x379   :  { %v865_v53 = vpop.xlane.xlu0 %864  ;;  %2577 = vmatprep.subr.mxu0 %v2969_v3  ;;  %v631_v35 = vmul.f32 %v2928_v41, %v3420_v55  ;;  %v3552_v25 = vpop.eup %2929 }
 0x37a   :  { %2935 = vrcp.f32 %v865_v53  ;;  %v2125_v28 = vsel %vm373_vm7, %v3552_v25, 0.0 }
 0x37b   :  { %1899 = vrot.lane.b32.xlu1 %v3210_v59, %s2972_s2  ;;  %2553 = vmatmul.mubr.msk.f32.gmra.mrb[18].mxu0 %vm366_vm6, %v631_v35 }
 0x37c   :  { %v2932_v0 = vpop.eup %2931  ;;  %2578 = vmatpush3.msk.msra.mxu0 %vm410_vm5, %v3345_v43  ;;  %2555 = vmatprep.mubr.msk.f32.mxu0 %vm2971_vm1, %v2969_v3 }
 0x37d   :  { %v868_v21 = vpop.xlane.xlu0 %867  ;;  %v633_v55 = vmul.f32 %v2932_v0, %v3425_v13  ;;  %2771 = vmatprep.subr.bf16.mxu0 %v2970_v16 }
 0x37e   :  { %2937 = vrcp.f32 %v868_v21  ;;  %2126 = vadd.xlane.f32.xlu0 %v2125_v28 }
 0x37f   :  { %2869 = vrot.lane.b32.xlu1 %v3177_v31, %s2974_s10  ;;  %2556 = vmatmul.mubr.msk.f32.gmra.mrb[20].mxu0 %vm366_vm6, %v633_v55 }
 0x380   :  { %v2934_v43 = vpop.eup %2933  ;;  %2579 = vmatprep.mubr.msk.f32.mxu0 %vm2971_vm1, %v2969_v3 }
 0x381   :  { %v870_v39 = vmul.f32 %v2934_v43, %v3430_v26  ;;  %v1101_v13 = vpop.xlane.xlu0 %1100 }
 0x382   :  { %2939 = vrcp.f32 %v1101_v13 }
 0x383   :  { %2138 = vrot.lane.b32.xlu1 %v3210_v59, %s2974_s10  ;;  %2580 = vmatmul.mubr.msk.f32.vlgmr.msra.gmra.mrb[22].mxu0 %vm366_vm6, %v870_v39 }
 0x384   :  { %v2936_v33 = vpop.eup %2935  ;;  %2773 = vmatpush3.bf16.msra.mxu0 %v2772_v42  ;;  %2582 = vmatprep.mubr.msk.f32.mxu0 %vm2971_vm1, %v2969_v3 }
 0x385   :  { %2607 = vmatprep.subr.mxu0 %v2969_v3  ;;  %v872_v31 = vmul.f32 %v2936_v33, %v3434_v6 }
 0x387   :  { %2583 = vmatmul.mubr.msk.f32.gmra.mrb[24].mxu0 %vm366_vm6, %v872_v31 }
 0x388   :  { %v2938_v26 = vpop.eup %2937  ;;  %2608 = vmatpush3.msk.msra.mxu0 %vm410_vm5, %v3456_v56  ;;  %2585 = vmatprep.mubr.msk.f32.mxu0 %vm2971_vm1, %v2969_v3 }
 0x389   :  { %v874_v5 = vmul.f32 %v2938_v26, %v3439_v48  ;;  %2778 = vmatprep.subr.bf16.mxu0 %v2970_v16  ;;  %v1107_v48 = vpop.xlane.xlu0 %1106 }
 0x38b   :  { %2586 = vmatmul.mubr.msk.f32.gmra.mrb[26].mxu0 %vm366_vm6, %v874_v5 }
 0x38c   :  { %v2940_v29 = vpop.eup %2939  ;;  %2609 = vmatprep.mubr.msk.f32.mxu0 %vm2971_vm1, %v2969_v3 }
 0x38d   :  { %v1109_v6 = vmul.f32 %v2940_v29, %v3443_v51 }
 0x38f   :  { %2610 = vmatmul.mubr.msk.f32.vlgmr.msra.gmra.mrb[28].mxu0 %vm366_vm6, %v1109_v6 }
 0x390   :  { %2780 = vmatpush3.bf16.msra.mxu0 %v2779_v32  ;;  %2612 = vmatprep.mubr.msk.f32.mxu0 %vm2971_vm1, %v2969_v3 }
 0x391   :  { %2637 = vmatprep.subr.mxu0 %v2969_v3  ;;  %v1403_v30 = vpop.xlane.xlu0 %1402 }
 0x394   :  { %2638 = vmatpush3.msk.msra.mxu0 %vm410_vm5, %v3210_v59 }
 0x395   :  { %2785 = vmatprep.subr.bf16.mxu0 %v2970_v16 }
 0x3b2   :  { %v1104_v56 = vpop.xlane.xlu1 %1103 }
 0x3b3   :  { %2941 = vrcp.f32 %v1104_v56 }
 0x3b4   :  { %2943 = vrcp.f32 %v1107_v48 }
 0x3b6   :  { %v1661_v17 = vpop.permute.xlu1 %1660 }
 0x3bd   :  { %v2942_v51 = vpop.eup %2941 }
 0x3be   :  { %v1111_v44 = vmul.f32 %v2942_v51, %v3463_v10  ;;  %v2944_v47 = vpop.eup %2943 }
 0x3bf   :  { %v1113_v27 = vmul.f32 %v2944_v47, %v3448_v11  ;;  %v2861_v11 = vunpack.i.l.bf16 %v3465_v49 }
 0x3c0   :  { %2613 = vmatmul.mubr.msk.f32.gmra.mrb[30].mxu0 %vm366_vm6, %v1111_v44 }
 0x3c1   :  { %2615 = vmatprep.mubr.msk.f32.mxu0 %vm2971_vm1, %v2969_v3  ;;  %v2786_v7 = vpack.c.bf16 %v2862_v12, %v2861_v11 }
 0x3c4   :  { %2616 = vmatmul.mubr.msk.f32.gmra.mrb[32].mxu0 %vm366_vm6, %v1113_v27 }
 0x3c5   :  { %2639 = vmatprep.mubr.msk.f32.mxu0 %vm2971_vm1, %v2969_v3 }
 0x3c6   :  { %v1643_v32 = vpop.xlane.xlu0 %1642 }
 0x3ca   :  { %v1646_v59 = vpop.xlane.xlu0 %1645 }
 0x3ce   :  { %v1882_v37 = vpop.xlane.xlu0 %1881 }
 0x3d2   :  { %v1885_v19 = vpop.xlane.xlu0 %1884 }
 0x3d6   :  { %v1888_v58 = vpop.xlane.xlu0 %1887 }
 0x3da   :  { %v2865_v20 = vpop.permute.xlu0 %2864 }
 0x3db   :  { %v2867_v15 = vunpack.i.h.bf16 %v2865_v20  ;;  %v2866_v46 = vunpack.i.l.bf16 %v2865_v20 }
 0x3dd   :  { %v2793_v0 = vpack.c.bf16 %v2867_v15, %v2866_v46 }
 0x3e7   :  { %v1400_v45 = vpop.xlane.xlu1 %1399 }
 0x3e8   :  { %2945 = vrcp.f32 %v1400_v45 }
 0x3e9   :  { %2947 = vrcp.f32 %v1403_v30 }
 0x3eb   :  { %v1406_v10 = vpop.xlane.xlu1 %1405 }
 0x3ec   :  { %2949 = vrcp.f32 %v1406_v10 }
 0x3ed   :  { %2951 = vrcp.f32 %v1643_v32 }
 0x3ee   :  { %2953 = vrcp.f32 %v1646_v59 }
 0x3ef   :  { %v1649_v40 = vpop.xlane.xlu1 %1648 }
 0x3f0   :  { %2955 = vrcp.f32 %v1649_v40 }
 0x3f1   :  { %2957 = vrcp.f32 %v1882_v37 }
 0x3f2   :  { %v2946_v52 = vpop.eup %2945  ;;  %2959 = vrcp.f32 %v1885_v19 }
 0x3f3   :  { %v1408_v2 = vmul.f32 %v2946_v52, %v3521_v50  ;;  %v2121_v24 = vpop.xlane.xlu1 %2120  ;;  %v2948_v18 = vpop.eup %2947  ;;  %2961 = vrcp.f32 %v1888_v58 }
 0x3f4   :  { %v1410_v63 = vmul.f32 %v2948_v18, %v3452_v4  ;;  %2963 = vrcp.f32 %v2121_v24 }
 0x3f5   :  { %2640 = vmatmul.mubr.msk.f32.vlgmr.msra.gmra.mrb[34].mxu0 %vm366_vm6, %v1408_v2 }
 0x3f6   :  { %2787 = vmatpush3.bf16.msra.mxu0 %v2786_v7  ;;  %2642 = vmatprep.mubr.msk.f32.mxu0 %vm2971_vm1, %v2969_v3  ;;  %v2950_v49 = vpop.eup %2949 }
 0x3f7   :  { %2667 = vmatprep.subr.mxu0 %v2969_v3  ;;  %v2124_v22 = vpop.xlane.xlu1 %2123  ;;  %v1412_v50 = vmul.f32 %v2950_v49, %v3525_v9  ;;  %v2952_v23 = vpop.eup %2951 }
 0x3f8   :  { %v1651_v34 = vmul.f32 %v2952_v23, %v3491_v62  ;;  %v2954_v35 = vpop.eup %2953  ;;  %2965 = vrcp.f32 %v2124_v22 }
 0x3f9   :  { %2643 = vmatmul.mubr.msk.f32.gmra.mrb[36].mxu0 %vm366_vm6, %v1410_v63  ;;  %v1653_v9 = vmul.f32 %v2954_v35, %v3498_v14 }
 0x3fa   :  { %2668 = vmatpush3.msk.msra.mxu0 %vm410_vm5, %v1661_v17  ;;  %2645 = vmatprep.mubr.msk.f32.mxu0 %vm2971_vm1, %v2969_v3  ;;  %v2956_v21 = vpop.eup %2955 }
 0x3fb   :  { %2792 = vmatprep.subr.bf16.mxu0 %v2970_v16  ;;  %v1900_v41 = vpop.permute.xlu1 %1899  ;;  %v1655_v60 = vmul.f32 %v2956_v21, %v3529_v36  ;;  %v2958_v38 = vpop.eup %2957 }
 0x3fc   :  { %v1890_v13 = vmul.f32 %v2958_v38, %v3502_v8  ;;  %v2960_v33 = vpop.eup %2959 }
 0x3fd   :  { %2646 = vmatmul.mubr.msk.f32.gmra.mrb[38].mxu0 %vm366_vm6, %v1412_v50  ;;  %v3624_v4 = vpop.f32.mrb[10].mxu0  ;;  %v1892_v36 = vmul.f32 %v2960_v33, %v3506_v61  ;;  %v2962_v26 = vpop.eup %2961 }
 0x3fe   :  { %2669 = vmatprep.mubr.msk.f32.mxu0 %vm2971_vm1, %v2969_v3  ;;  %v2521_v53 = vpop.f32.mrb[11].mxu0  ;;  %v1894_v8 = vmul.f32 %v2962_v26, %v3512_v54  ;;  %v2964_v29 = vpop.eup %2963 }
 0x3ff   :  { %v2870_v28 = vpop.permute.xlu1 %2869  ;;  %v2129_v61 = vmul.f32 %v2964_v29, %v3535_v1 }
 0x400   :  { %v2872_v43 = vunpack.i.h.bf16 %v2870_v28  ;;  %v2871_v14 = vunpack.i.l.bf16 %v2870_v28 }
 0x401   :  { %2670 = vmatmul.mubr.msk.f32.vlgmr.msra.gmra.mrb[40].mxu0 %vm366_vm6, %v1651_v34 }
 0x402   :  { %2794 = vmatpush3.bf16.msra.mxu0 %v2793_v0  ;;  %2672 = vmatprep.mubr.msk.f32.mxu0 %vm2971_vm1, %v2969_v3  ;;  %v2800_v31 = vpack.c.bf16 %v2872_v43, %v2871_v14  ;;  %v2966_v6 = vpop.eup %2965 }
 0x403   :  { %2697 = vmatprep.subr.mxu0 %v2969_v3  ;;  %v2139_v5 = vpop.permute.xlu1 %2138  ;;  %v2131_v48 = vmul.f32 %v2966_v6, %v3539_v57 }
 0x405   :  { %2673 = vmatmul.mubr.msk.f32.gmra.mrb[42].mxu0 %vm366_vm6, %v1653_v9  ;;  %v3635_v62 = vpop.f32.mrb[12].mxu0 }
 0x406   :  { %2698 = vmatpush3.msk.msra.mxu0 %vm410_vm5, %v1900_v41  ;;  %2675 = vmatprep.mubr.msk.f32.mxu0 %vm2971_vm1, %v2969_v3  ;;  %v2524_v55 = vpop.f32.mrb[13].mxu0 }
 0x407   :  { %2799 = vmatprep.subr.bf16.mxu0 %v2970_v16 }
 0x409   :  { %2676 = vmatmul.mubr.msk.f32.gmra.mrb[44].mxu0 %vm366_vm6, %v1655_v60  ;;  %v3643_v39 = vpop.f32.mrb[14].mxu0 }
 0x40a   :  { %2699 = vmatprep.mubr.msk.f32.mxu0 %vm2971_vm1, %v2969_v3  ;;  %v2527_v42 = vpop.f32.mrb[15].mxu0 }
 0x40b   :  { %v2127_v16 = vpop.xlane.xlu0 %2126 }
 0x40c   :  { %2967 = vrcp.f32 %v2127_v16 }
 0x40d   :  { %2700 = vmatmul.mubr.msk.f32.vlgmr.msra.gmra.mrb[46].mxu0 %vm366_vm6, %v1890_v13 }
 0x40e   :  { %2801 = vmatpush3.bf16.msra.mxu0 %v2800_v31  ;;  %2702 = vmatprep.mubr.msk.f32.mxu0 %vm2971_vm1, %v2969_v3 }
 0x40f   :  { %2727 = vmatprep.subr.mxu0 %v2969_v3 }
 0x411   :  { %2703 = vmatmul.mubr.msk.f32.gmra.mrb[48].mxu0 %vm366_vm6, %v1892_v36 }
 0x412   :  { %2728 = vmatpush3.msk.msra.mxu0 %vm410_vm5, %v2139_v5  ;;  %2705 = vmatprep.mubr.msk.f32.mxu0 %vm2971_vm1, %v2969_v3 }
 0x415   :  { %2706 = vmatmul.mubr.msk.f32.gmra.mrb[50].mxu0 %vm366_vm6, %v1894_v8 }
 0x416   :  { %2729 = vmatprep.mubr.msk.f32.mxu0 %vm2971_vm1, %v2969_v3  ;;  %v2968_v56 = vpop.eup %2967 }
 0x417   :  { %v2133_v54 = vmul.f32 %v2968_v56, %v3552_v25 }
 0x419   :  { %2730 = vmatmul.mubr.msk.f32.vlgmr.msra.gmra.mrb[52].mxu0 %vm366_vm6, %v2129_v61 }
 0x41a   :  { %2732 = vmatprep.mubr.msk.f32.mxu0 %vm2971_vm1, %v2969_v3 }
 0x41d   :  { %2733 = vmatmul.mubr.msk.f32.gmra.mrb[54].mxu0 %vm366_vm6, %v2131_v48 }
 0x41e   :  { %2735 = vmatprep.mubr.msk.f32.mxu0 %vm2971_vm1, %v2969_v3 }
 0x421   :  { %2736 = vmatmul.mubr.msk.f32.gmra.mrb[56].mxu0 %vm366_vm6, %v2133_v54 }
 0x44a   :  { %v721_v51 = vpop.f32.mrb[16].mxu0 }
 0x44b   :  { %1216 = vrot.lane.b32.xlu0 %v721_v51, %s2975_s11  ;;  %v2551_v1 = vpop.f32.mrb[17].mxu0 }
 0x44e   :  { %v726_v44 = vpop.f32.mrb[18].mxu0 }
 0x44f   :  { %1218 = vrot.lane.b32.xlu1 %v726_v44, %s2975_s11  ;;  %v2554_v47 = vpop.f32.mrb[19].mxu0 }
 0x452   :  { %v731_v57 = vpop.f32.mrb[20].mxu0 }
 0x453   :  { %1220 = vrot.lane.b32.xlu1 %v731_v57, %s2975_s11  ;;  %v2557_v27 = vpop.f32.mrb[21].mxu0 }
 0x456   :  { %v960_v30 = vpop.f32.mrb[22].mxu0 }
 0x457   :  { %1228 = vrot.lane.b32.xlu0 %v960_v30, %s2976_s12  ;;  %v2581_v3 = vpop.f32.mrb[23].mxu0 }
 0x45a   :  { %v965_v25 = vpop.f32.mrb[24].mxu0 }
 0x45b   :  { %1230 = vrot.lane.b32.xlu1 %v965_v25, %s2976_s12  ;;  %v2584_v32 = vpop.f32.mrb[25].mxu0 }
 0x45e   :  { %v970_v59 = vpop.f32.mrb[26].mxu0 }
 0x45f   :  { %1232 = vrot.lane.b32.xlu0 %v970_v59, %s2976_s12  ;;  %v2587_v17 = vpop.f32.mrb[27].mxu0 }
 0x462   :  { %v1199_v37 = vpop.f32.mrb[28].mxu0 }
 0x463   :  { %1240 = vrot.lane.b32.xlu0 %v1199_v37, %s2977_s13  ;;  %v2611_v45 = vpop.f32.mrb[29].mxu0 }
 0x493   :  { %v1204_v10 = vpop.f32.mrb[30].mxu0 }
 0x494   :  { %1242 = vrot.lane.b32.xlu1 %v1204_v10, %s2977_s13  ;;  %v2614_v19 = vpop.f32.mrb[31].mxu0 }
 0x497   :  { %v1209_v40 = vpop.f32.mrb[32].mxu0 }
 0x498   :  { %1244 = vrot.lane.b32.xlu0 %v1209_v40, %s2977_s13  ;;  %v2617_v12 = vpop.f32.mrb[33].mxu0 }
 0x4bd   :  { %v1217_v52 = vpop.permute.xlu0 %1216 }
 0x4be   :  { %v1249_v20 = vsel %vm264_vm2, %v3624_v4, %v1217_v52 }
 0x4c1   :  { %v1219_v33 = vpop.permute.xlu1 %1218 }
 0x4c2   :  { %v1250_v36 = vsel %vm264_vm2, %v3635_v62, %v1219_v33 }
 0x4c5   :  { %v1221_v31 = vpop.permute.xlu1 %1220 }
 0x4c6   :  { %v1251_v29 = vsel %vm264_vm2, %v3643_v39, %v1221_v31 }
 0x4c8   :  { %v3680_v11 = vpop.f32.mrb[34].mxu0 }
 0x4c9   :  { %v2641_v58 = vpop.f32.mrb[35].mxu0  ;;  %v1229_v24 = vpop.permute.xlu0 %1228 }
 0x4ca   :  { %v1252_v50 = vsel %vm43_vm0, %v1249_v20, %v1229_v24 }
 0x4cc   :  { %v3682_v2 = vpop.f32.mrb[36].mxu0 }
 0x4cd   :  { %v2644_v18 = vpop.f32.mrb[37].mxu0  ;;  %v1231_v16 = vpop.permute.xlu1 %1230 }
 0x4ce   :  { %v1253_v26 = vsel %vm43_vm0, %v1250_v36, %v1231_v16 }
 0x4d0   :  { %v3684_v7 = vpop.f32.mrb[38].mxu0 }
 0x4d1   :  { %v2647_v63 = vpop.f32.mrb[39].mxu0  ;;  %v1233_v49 = vpop.permute.xlu0 %1232 }
 0x4d2   :  { %v1254_v61 = vsel %vm43_vm0, %v1251_v29, %v1233_v49 }
 0x4d4   :  { %v1741_v22 = vpop.f32.mrb[40].mxu0 }
 0x4d5   :  { %2236 = vrot.lane.b32.xlu1 %v1741_v22, %s2975_s11  ;;  %v2671_v23 = vpop.f32.mrb[41].mxu0  ;;  %v1241_v15 = vpop.permute.xlu0 %1240 }
 0x4d6   :  { %v1256_v46 = vsel %vm1255_vm8, %v1252_v50, %v1241_v15 }
 0x4d7   :  { %1260 = vst.msk [vmem:[%s3746_s3] sm:$0xff] %vm1259_vm9, %v1256_v46 }
 0x4d8   :  { %v1746_v34 = vpop.f32.mrb[42].mxu0 }
 0x4d9   :  { %2238 = vrot.lane.b32.xlu1 %v1746_v34, %s2975_s11  ;;  %v2674_v41 = vpop.f32.mrb[43].mxu0 }
 0x4dc   :  { %v1751_v4 = vpop.f32.mrb[44].mxu0 }
 0x4dd   :  { %2240 = vrot.lane.b32.xlu1 %v1751_v4, %s2975_s11  ;;  %v2677_v53 = vpop.f32.mrb[45].mxu0 }
 0x4e0   :  { %v1980_v35 = vpop.f32.mrb[46].mxu0 }
 0x4e1   :  { %2248 = vrot.lane.b32.xlu1 %v1980_v35, %s2976_s12  ;;  %v2701_v0 = vpop.f32.mrb[47].mxu0 }
 0x4e4   :  { %v1985_v9 = vpop.f32.mrb[48].mxu0 }
 0x4e5   :  { %2250 = vrot.lane.b32.xlu0 %v1985_v9, %s2976_s12  ;;  %v2704_v21 = vpop.f32.mrb[49].mxu0 }
 0x4e8   :  { %v1990_v28 = vpop.f32.mrb[50].mxu0 }
 0x4e9   :  { %2252 = vrot.lane.b32.xlu1 %v1990_v28, %s2976_s12  ;;  %v2707_v55 = vpop.f32.mrb[51].mxu0 }
 0x4ec   :  { %v2219_v60 = vpop.f32.mrb[52].mxu0 }
 0x4ed   :  { %2260 = vrot.lane.b32.xlu1 %v2219_v60, %s2977_s13  ;;  %v2731_v38 = vpop.f32.mrb[53].mxu0 }
 0x4f0   :  { %v2224_v43 = vpop.f32.mrb[54].mxu0 }
 0x4f1   :  { %2262 = vrot.lane.b32.xlu0 %v2224_v43, %s2977_s13  ;;  %v2734_v14 = vpop.f32.mrb[55].mxu0 }
 0x4f4   :  { %v2229_v13 = vpop.f32.mrb[56].mxu0 }
 0x4f5   :  { %2264 = vrot.lane.b32.xlu1 %v2229_v13, %s2977_s13  ;;  %v2737_v42 = vpop.f32.mrb[57].mxu0 }
 0x506   :  { %v1243_v5 = vpop.permute.xlu1 %1242 }
 0x507   :  { %v1257_v8 = vsel %vm1255_vm8, %v1253_v26, %v1243_v5 }
 0x508   :  { %1261 = vst.msk [vmem:[%s3746_s3 + $0x8] sm:$0xff] %vm1259_vm9, %v1257_v8 }
 0x50a   :  { %v1245_v6 = vpop.permute.xlu0 %1244 }
 0x50b   :  { %v1258_v48 = vsel %vm1255_vm8, %v1254_v61, %v1245_v6 }
 0x50c   :  { %1263 = vst.msk [vmem:[%s3746_s3 + $0x10] sm:$0x3f] %vm1262_vm10, %v1258_v48 }
 0x547   :  { %v2237_v62 = vpop.permute.xlu1 %2236 }
 0x548   :  { %v2269_v44 = vsel %vm264_vm2, %v3680_v11, %v2237_v62 }
 0x54b   :  { %v2239_v56 = vpop.permute.xlu1 %2238 }
 0x54c   :  { %v2270_v30 = vsel %vm264_vm2, %v3682_v2, %v2239_v56 }
 0x54f   :  { %v2241_v54 = vpop.permute.xlu1 %2240 }
 0x550   :  { %v2271_v59 = vsel %vm264_vm2, %v3684_v7, %v2241_v54 }
 0x553   :  { %v2249_v51 = vpop.permute.xlu1 %2248 }
 0x554   :  { %v2272_v39 = vsel %vm43_vm0, %v2269_v44, %v2249_v51 }
 0x557   :  { %v2251_v47 = vpop.permute.xlu0 %2250 }
 0x558   :  { %v2273_v3 = vsel %vm43_vm0, %v2270_v30, %v2251_v47 }
 0x55b   :  { %v2253_v1 = vpop.permute.xlu1 %2252 }
 0x55c   :  { %v2274_v17 = vsel %vm43_vm0, %v2271_v59, %v2253_v1 }
 0x55f   :  { %v2261_v57 = vpop.permute.xlu1 %2260 }
 0x560   :  { %v2275_v27 = vsel %vm1255_vm8, %v2272_v39, %v2261_v57 }
 0x561   :  { %2378 = vst.msk [vmem:[%s3746_s3 + $0x18] sm:$0xff] %vm1259_vm9, %v2275_v27 }
 0x563   :  { %v2263_v25 = vpop.permute.xlu0 %2262 }
 0x564   :  { %v2276_v32 = vsel %vm1255_vm8, %v2273_v3, %v2263_v25 }
 0x565   :  { %2379 = vst.msk [vmem:[%s3746_s3 + $0x20] sm:$0xff] %vm1259_vm9, %v2276_v32 }
 0x567   :  { %v2265_v37 = vpop.permute.xlu1 %2264 }
 0x568   :  { %v2277_v45 = vsel %vm1255_vm8, %v2274_v17, %v2265_v37 }
 0x569   :  { %2380 = vst.msk [vmem:[%s3746_s3 + $0x28] sm:$0x3f] %vm1262_vm10, %v2277_v45 }

</bundles_post_ra>
